<compile_context>
chip_gen: v7x
topology: tpu7x:2x2x1
jax: 0.10.0
libtpu: 0.0.40
codegen_flags: <defaults>
</compile_context>

<pallas_src>
import numpy as np
import jax
import jax.numpy as jnp
from jax.experimental import pallas as pl
from jax.experimental.pallas import tpu as pltpu

# ----- hyper-parameters (mirroring the PyTorch script) -----
TEXT = 'hello world! this is a simple LLM.'
VOCAB = len(sorted(set(TEXT)))          # SimpleTokenizer.vocab_size == 18
VOCAB_PAD = 128                         # lane-dense padded vocab for the output slab
D_MODEL = 32
DIM_FF = 64
MAX_LEN = 100
N_HEADS = 2
HEAD_DIM = D_MODEL // N_HEADS
NUM_LAYERS = 2
LN_EPS = 1e-5
NEG_INF = -1e30

# ----- packed parameter slab layout: single (TOTAL_ROWS, 128) f32 input -----
LANES = 128
_L_WQKV_S, _L_WO_S = 0, 32          # self-attn fused [Wq|Wk|Wv] (32x96), Wo (32x32)
_L_WQKV_C, _L_WO_C = 64, 96         # cross-attn fused [Wq|Wk|Wv] (32x96), Wo (32x32)
_L_WFF1, _L_WFF2 = 128, 160         # FFN W1 (32x64), W2 (64x32)
_L_VEC = 224                        # 12 bias / LayerNorm rows:
#   +0 b_qkv_self(96) | +1 b_o_self(32) | +2 b_qkv_cross(96) | +3 b_o_cross(32)
#   +4 b_ff1(64)      | +5 b_ff2(32)    | +6..+11 ln1_g,ln1_b,ln2_g,ln2_b,ln3_g,ln3_b
LAYER_ROWS = 240                    # multiple of 8 (sublane aligned)
_FC_W = NUM_LAYERS * LAYER_ROWS     # 480 : fc_out weight (32x128, vocab zero-padded)
_FC_B = _FC_W + D_MODEL             # 512 : fc_out bias   (1x128)
TOTAL_ROWS = ((_FC_B + 1 + 7) // 8) * 8   # 520


# ---------------------------------------------------------------------------
# Math helpers, shared by the Pallas kernel and the pure-JAX reference.
# Everything works on flat 2-D (seq*batch, features) operands.
# ---------------------------------------------------------------------------
def _carve_params(p):
    """Carve the packed (TOTAL_ROWS, 128) slab into per-layer parameter views.

    `p` may be a VMEM Ref (inside the kernel every slice is a small static
    VMEM load) or a jnp array (pure-JAX reference)."""
    E, E3 = D_MODEL, 3 * D_MODEL
    layers = []
    for l in range(NUM_LAYERS):
        b = l * LAYER_ROWS
        v = b + _L_VEC
        layers.append(dict(
            w_qkv_s=p[b + _L_WQKV_S:b + _L_WQKV_S + E, 0:E3],
            w_o_s=p[b + _L_WO_S:b + _L_WO_S + E, 0:E],
            w_q_c=p[b + _L_WQKV_C:b + _L_WQKV_C + E, 0:E],
            w_kv_c=p[b + _L_WQKV_C:b + _L_WQKV_C + E, E:E3],
            w_o_c=p[b + _L_WO_C:b + _L_WO_C + E, 0:E],
            w_ff1=p[b + _L_WFF1:b + _L_WFF1 + E, 0:DIM_FF],
            w_ff2=p[b + _L_WFF2:b + _L_WFF2 + DIM_FF, 0:E],
            b_qkv_s=p[v + 0:v + 1, 0:E3],
            b_o_s=p[v + 1:v + 2, 0:E],
            b_q_c=p[v + 2:v + 3, 0:E],
            b_kv_c=p[v + 2:v + 3, E:E3],
            b_o_c=p[v + 3:v + 4, 0:E],
            b_ff1=p[v + 4:v + 5, 0:DIM_FF],
            b_ff2=p[v + 5:v + 6, 0:E],
            ln1_g=p[v + 6:v + 7, 0:E], ln1_b=p[v + 7:v + 8, 0:E],
            ln2_g=p[v + 8:v + 9, 0:E], ln2_b=p[v + 9:v + 10, 0:E],
            ln3_g=p[v + 10:v + 11, 0:E], ln3_b=p[v + 11:v + 12, 0:E],
        ))
    fc_w = p[_FC_W:_FC_W + D_MODEL, 0:VOCAB_PAD]
    fc_b = p[_FC_B:_FC_B + 1, 0:VOCAB_PAD]
    return layers, fc_w, fc_b


def _layernorm(x, g, b):
    # single-pass statistics: mean and E[x^2] reduced from the same input,
    # removing one serialized cross-lane reduction per LayerNorm.
    mu = jnp.mean(x, axis=-1, keepdims=True)
    m2 = jnp.mean(x * x, axis=-1, keepdims=True)
    var = m2 - mu * mu
    return (x - mu) * jax.lax.rsqrt(var + LN_EPS) * g + b


def _softmax_rows(sc, use_pl_recip):
    sc = sc - jnp.max(sc, axis=-1, keepdims=True)
    e = jnp.exp(sc)
    denom = jnp.sum(e, axis=-1, keepdims=True)
    if use_pl_recip:
        return e * pl.reciprocal(denom, approx=True)
    return e / denom


def _attention(q, k, v, bias, wo, bo, use_pl_recip):
    """Per-head attention on flat (rows, E) operands with an additive batch-block
    bias. K is transposed once (full E width); each head's context is pushed
    straight through its slice of the out-projection and accumulated (no
    lane-concat of heads)."""
    scale = 1.0 / float(np.sqrt(HEAD_DIM))
    kt = k.T                                      # (E, rows_k): one transpose per attention
    out = None
    for h in range(N_HEADS):                      # static unroll over 2 heads
        lo, hi = h * HEAD_DIM, (h + 1) * HEAD_DIM
        sc = jnp.dot(q[:, lo:hi], kt[lo:hi, :],
                     preferred_element_type=jnp.float32) * scale + bias
        attn = _softmax_rows(sc, use_pl_recip)
        oh = jnp.dot(attn, v[:, lo:hi], preferred_element_type=jnp.float32)
        ph = jnp.dot(oh, wo[lo:hi, :], preferred_element_type=jnp.float32)
        out = ph if out is None else out + ph
    return out + bo


def _batch_bias(rows_q, rows_k, n_batch):
    # additive mask: 0 where query/key rows share the batch index, -1e30 otherwise.
    # Rows are ordered (seq, batch) with batch fastest, so batch_id = row mod N.
    # Built from int iota cast to f32 + floor (exact for these small integers) so it
    # lowers to plain VPU ops inside the kernel (no integer div/rem lowering needed).
    nb = jnp.float32(n_batch)
    r = jax.lax.broadcasted_iota(jnp.int32, (rows_q, rows_k), 0).astype(jnp.float32)
    c = jax.lax.broadcasted_iota(jnp.int32, (rows_q, rows_k), 1).astype(jnp.float32)
    rb = r - nb * jnp.floor(r / nb)
    cb = c - nb * jnp.floor(c / nb)
    return jnp.where(rb == cb, 0.0, NEG_INF).astype(jnp.float32)


def _decoder_core(x, mem, self_bias, cross_bias, layers, fc_w, fc_b, use_pl_recip):
    # TODO(synk): dropout (p=0.1 inside nn.TransformerDecoderLayer) is identity (eval mode).
    for lp in layers:
        # --- self-attention: single fused QKV matmul (E x 3E) ---
        qkv = jnp.dot(x, lp['w_qkv_s'], preferred_element_type=jnp.float32) + lp['b_qkv_s']
        sa = _attention(qkv[:, 0:D_MODEL], qkv[:, D_MODEL:2 * D_MODEL],
                        qkv[:, 2 * D_MODEL:3 * D_MODEL],
                        self_bias, lp['w_o_s'], lp['b_o_s'], use_pl_recip)
        x = _layernorm(x + sa, lp['ln1_g'], lp['ln1_b'])

        # --- cross-attention: Q from x, fused KV matmul (E x 2E) from memory ---
        q = jnp.dot(x, lp['w_q_c'], preferred_element_type=jnp.float32) + lp['b_q_c']
        kv = jnp.dot(mem, lp['w_kv_c'], preferred_element_type=jnp.float32) + lp['b_kv_c']
        ca = _attention(q, kv[:, 0:D_MODEL], kv[:, D_MODEL:2 * D_MODEL],
                        cross_bias, lp['w_o_c'], lp['b_o_c'], use_pl_recip)
        x = _layernorm(x + ca, lp['ln2_g'], lp['ln2_b'])

        # --- feed-forward (ReLU) ---
        hidden = jnp.maximum(
            jnp.dot(x, lp['w_ff1'], preferred_element_type=jnp.float32) + lp['b_ff1'], 0.0)
        ff = jnp.dot(hidden, lp['w_ff2'], preferred_element_type=jnp.float32) + lp['b_ff2']
        x = _layernorm(x + ff, lp['ln3_g'], lp['ln3_b'])

    # lane-dense (rows, VOCAB_PAD=128) logits slab; padded vocab columns stay zero.
    return jnp.dot(x, fc_w, preferred_element_type=jnp.float32) + fc_b


# ---------------------------------------------------------------------------
# Pallas kernel wrapper: whole decoder stack + output projection, VMEM-resident.
# ---------------------------------------------------------------------------
def _cost_estimate(rows_q, rows_k):
    E, F, H, HD = D_MODEL, DIM_FF, N_HEADS, HEAD_DIM
    per_layer = (
        2 * rows_q * E * (3 * E)                    # self fused QKV
        + H * (2 * rows_q * rows_q * HD) * 2        # self scores + attn@V
        + H * (2 * rows_q * HD * E)                 # self out-proj
        + 2 * rows_q * E * E                        # cross Q
        + 2 * rows_k * E * (2 * E)                  # cross fused KV
        + H * (2 * rows_q * rows_k * HD) * 2        # cross scores + attn@V
        + H * (2 * rows_q * HD * E)                 # cross out-proj
        + 2 * (2 * rows_q * E * F)                  # FFN
    )
    flops = NUM_LAYERS * per_layer + 2 * rows_q * E * VOCAB_PAD
    trans = NUM_LAYERS * H * (rows_q * rows_q + rows_q * rows_k)      # exp
    trans += NUM_LAYERS * 3 * rows_q + NUM_LAYERS * 2 * H * rows_q    # rsqrt / recip
    bytes_acc = 4 * (rows_q * D_MODEL + rows_k * D_MODEL
                     + TOTAL_ROWS * LANES + rows_q * VOCAB_PAD)
    return pl.CostEstimate(flops=int(flops), transcendentals=int(trans),
                           bytes_accessed=int(bytes_acc))


def transformer_decoder_forward(input_seq, memory, params):
    L, N = input_seq.shape
    S, Nm = memory.shape
    assert N == Nm, "batch dims of input_seq and memory must match"
    # Dense (L*N, S*N) batch-masked attention is intended for small problems only;
    # grid over the row/batch dimension before scaling these shapes up.
    assert L * N <= 512 and S * N <= 512, "add a row grid before scaling this kernel"

    emb, pos = params['embedding'], params['pos']
    # glue: embedding gather + learned positional encoding (added along dim 1,
    # exactly like the PyTorch module), then flatten to 2-D (seq*batch, E).
    tgt = (emb[input_seq] + pos[:, :min(N, MAX_LEN), :]).reshape(L * N, D_MODEL)
    mem = (emb[memory] + pos[:, :min(Nm, MAX_LEN), :]).reshape(S * N, D_MODEL)

    rows_q, rows_k = L * N, S * N

    def kernel(tgt_ref, mem_ref, pslab_ref, out_ref):
        self_bias = _batch_bias(rows_q, rows_q, N)      # generated in-kernel (no DMA)
        cross_bias = _batch_bias(rows_q, rows_k, N)
        layers, fc_w, fc_b = _carve_params(pslab_ref)   # static VMEM views of the slab
        out_ref[...] = _decoder_core(
            tgt_ref[...], mem_ref[...], self_bias, cross_bias,
            layers, fc_w, fc_b, use_pl_recip=True).astype(out_ref.dtype)

    out_pad = pl.pallas_call(
        kernel,
        out_shape=jax.ShapeDtypeStruct((rows_q, VOCAB_PAD), jnp.float32),
        in_specs=[pl.BlockSpec(memory_space=pltpu.MemorySpace.VMEM)] * 3,
        out_specs=pl.BlockSpec(memory_space=pltpu.MemorySpace.VMEM),
        cost_estimate=_cost_estimate(rows_q, rows_k),
    )(tgt, mem, params['pslab'])
    return out_pad[:, :VOCAB].reshape(L, N, VOCAB)


# ---------------------------------------------------------------------------
# Deterministic synthetic parameter initialization (PyTorch __init__ shapes,
# then transposed / packed into one 2-D slab kernel input).
# ---------------------------------------------------------------------------
def init_params(key):
    keys = iter(jax.random.split(key, 64))

    def normal(shape, scale=0.1):
        return np.asarray(scale * jax.random.normal(next(keys), shape, dtype=jnp.float32))

    embedding = jax.random.normal(next(keys), (VOCAB, D_MODEL), jnp.float32)
    pos = jax.random.normal(next(keys), (1, MAX_LEN, D_MODEL), jnp.float32)

    slab = np.zeros((TOTAL_ROWS, LANES), np.float32)

    def put(r0, arr):
        arr = np.atleast_2d(np.asarray(arr, np.float32))
        slab[r0:r0 + arr.shape[0], :arr.shape[1]] = arr

    for l in range(NUM_LAYERS):
        base = l * LAYER_ROWS
        v = base + _L_VEC
        # self- and cross-attention blocks (nn.MultiheadAttention in_proj / out_proj)
        for w_row, o_row, bi_row, bo_row in ((_L_WQKV_S, _L_WO_S, 0, 1),
                                             (_L_WQKV_C, _L_WO_C, 2, 3)):
            in_w = normal((3 * D_MODEL, D_MODEL))        # in_proj_weight
            in_b = normal((3 * D_MODEL,), 0.02)
            out_w = normal((D_MODEL, D_MODEL))
            out_b = normal((D_MODEL,), 0.02)
            put(base + w_row, in_w.T)                    # fused (E, 3E) = [Wq|Wk|Wv]
            put(base + o_row, out_w.T)                   # (E, E)
            put(v + bi_row, in_b)                        # (1, 3E)
            put(v + bo_row, out_b)                       # (1, E)
        # feed-forward
        w1, b1 = normal((DIM_FF, D_MODEL)), normal((DIM_FF,), 0.02)
        w2, b2 = normal((D_MODEL, DIM_FF)), normal((D_MODEL,), 0.02)
        put(base + _L_WFF1, w1.T)                        # (E, DIM_FF)
        put(base + _L_WFF2, w2.T)                        # (DIM_FF, E)
        put(v + 4, b1)
        put(v + 5, b2)
        # 3 LayerNorms (gamma=1, beta=0)
        for i in range(3):
            put(v + 6 + 2 * i, np.ones((D_MODEL,), np.float32))
            put(v + 7 + 2 * i, np.zeros((D_MODEL,), np.float32))

    fc_w, fc_b = normal((VOCAB, D_MODEL)), normal((VOCAB,), 0.02)
    put(_FC_W, fc_w.T)                                   # (E, VOCAB) in first 18 of 128 lanes
    put(_FC_B, fc_b)

    return {'embedding': embedding, 'pos': pos, 'pslab': jnp.asarray(slab)}


if __name__ == "__main__":
    key = jax.random.PRNGKey(0)
    pkey, dkey1, dkey2 = jax.random.split(key, 3)
    params = init_params(pkey)

    # small shapes consistent with the module: tokens in [0, vocab_size)
    input_seq = jax.random.randint(dkey1, (2, 8), 0, VOCAB, dtype=jnp.int32)
    memory = jax.random.randint(dkey2, (3, 8), 0, VOCAB, dtype=jnp.int32)

    out = transformer_decoder_forward(input_seq, memory, params)
    out = jax.block_until_ready(out)
    assert out.shape == (2, 8, VOCAB)

    # pure-JAX reference (identical packed params / math, exact reciprocal)
    L, N = input_seq.shape
    S = memory.shape[0]
    emb, pos = params['embedding'], params['pos']
    tgt_ref = (emb[input_seq] + pos[:, :min(N, MAX_LEN), :]).reshape(L * N, D_MODEL)
    mem_ref = (emb[memory] + pos[:, :min(N, MAX_LEN), :]).reshape(S * N, D_MODEL)
    layers, fc_w, fc_b = _carve_params(params['pslab'])
    ref_pad = _decoder_core(tgt_ref, mem_ref,
                            _batch_bias(L * N, L * N, N), _batch_bias(L * N, S * N, N),
                            layers, fc_w, fc_b, use_pl_recip=False)
    ref = ref_pad[:, :VOCAB].reshape(L, N, VOCAB)
    np.testing.assert_allclose(np.asarray(out), np.asarray(ref), rtol=5e-3, atol=5e-3)

    print("KERNEL_OK")
</pallas_src>

<mosaic_0001>
module attributes {stable_mosaic.version = 11 : i64} {
  func.func @kernel(%arg0: memref<16x32xf32, #tpu.memory_space<vmem>>, %arg1: memref<24x32xf32, #tpu.memory_space<vmem>>, %arg2: memref<520x128xf32, #tpu.memory_space<vmem>>, %arg3: memref<16x128xf32, #tpu.memory_space<vmem>>) attributes {dimension_semantics = [], scalar_prefetch = 0 : i64, scratch_operands = 0 : i64, tpu.core_type = #tpu.core_type<tc>} {
    %0 = tpu.iota {dimensions = array<i32: 0>} : vector<16x16xi32>
    %1 = arith.sitofp %0 : vector<16x16xi32> to vector<16x16xf32>
    %2 = tpu.iota {dimensions = array<i32: 1>} : vector<16x16xi32>
    %3 = arith.sitofp %2 : vector<16x16xi32> to vector<16x16xf32>
    %cst = arith.constant 8.000000e+00 : f32
    %4 = vector.broadcast %cst : f32 to vector<16x16xf32>
    %5 = arith.divf %1, %4 : vector<16x16xf32>
    %6 = math.floor %5 : vector<16x16xf32>
    %cst_0 = arith.constant 8.000000e+00 : f32
    %7 = vector.broadcast %cst_0 : f32 to vector<16x16xf32>
    %8 = arith.mulf %7, %6 : vector<16x16xf32>
    %9 = arith.subf %1, %8 : vector<16x16xf32>
    %cst_1 = arith.constant 8.000000e+00 : f32
    %10 = vector.broadcast %cst_1 : f32 to vector<16x16xf32>
    %11 = arith.divf %3, %10 : vector<16x16xf32>
    %12 = math.floor %11 : vector<16x16xf32>
    %cst_2 = arith.constant 8.000000e+00 : f32
    %13 = vector.broadcast %cst_2 : f32 to vector<16x16xf32>
    %14 = arith.mulf %13, %12 : vector<16x16xf32>
    %15 = arith.subf %3, %14 : vector<16x16xf32>
    %16 = arith.cmpf oeq, %9, %15 : vector<16x16xf32>
    %cst_3 = arith.constant 0.000000e+00 : f32
    %cst_4 = arith.constant -1.000000e+30 : f32
    %17 = vector.broadcast %cst_3 : f32 to vector<16x16xf32>
    %18 = vector.broadcast %cst_4 : f32 to vector<16x16xf32>
    %19 = arith.select %16, %17, %18 : vector<16x16xi1>, vector<16x16xf32>
    %20 = tpu.iota {dimensions = array<i32: 0>} : vector<16x24xi32>
    %21 = arith.sitofp %20 : vector<16x24xi32> to vector<16x24xf32>
    %22 = tpu.iota {dimensions = array<i32: 1>} : vector<16x24xi32>
    %23 = arith.sitofp %22 : vector<16x24xi32> to vector<16x24xf32>
    %cst_5 = arith.constant 8.000000e+00 : f32
    %24 = vector.broadcast %cst_5 : f32 to vector<16x24xf32>
    %25 = arith.divf %21, %24 : vector<16x24xf32>
    %26 = math.floor %25 : vector<16x24xf32>
    %cst_6 = arith.constant 8.000000e+00 : f32
    %27 = vector.broadcast %cst_6 : f32 to vector<16x24xf32>
    %28 = arith.mulf %27, %26 : vector<16x24xf32>
    %29 = arith.subf %21, %28 : vector<16x24xf32>
    %cst_7 = arith.constant 8.000000e+00 : f32
    %30 = vector.broadcast %cst_7 : f32 to vector<16x24xf32>
    %31 = arith.divf %23, %30 : vector<16x24xf32>
    %32 = math.floor %31 : vector<16x24xf32>
    %cst_8 = arith.constant 8.000000e+00 : f32
    %33 = vector.broadcast %cst_8 : f32 to vector<16x24xf32>
    %34 = arith.mulf %33, %32 : vector<16x24xf32>
    %35 = arith.subf %23, %34 : vector<16x24xf32>
    %36 = arith.cmpf oeq, %29, %35 : vector<16x24xf32>
    %cst_9 = arith.constant 0.000000e+00 : f32
    %cst_10 = arith.constant -1.000000e+30 : f32
    %37 = vector.broadcast %cst_9 : f32 to vector<16x24xf32>
    %38 = vector.broadcast %cst_10 : f32 to vector<16x24xf32>
    %39 = arith.select %36, %37, %38 : vector<16x24xi1>, vector<16x24xf32>
    %c0 = arith.constant 0 : index
    %c0_11 = arith.constant 0 : index
    %40 = vector.load %arg2[%c0, %c0_11] : memref<520x128xf32, #tpu.memory_space<vmem>>, vector<32x96xf32>
    %c32 = arith.constant 32 : index
    %c0_12 = arith.constant 0 : index
    %41 = vector.load %arg2[%c32, %c0_12] : memref<520x128xf32, #tpu.memory_space<vmem>>, vector<32x32xf32>
    %c64 = arith.constant 64 : index
    %c0_13 = arith.constant 0 : index
    %42 = vector.load %arg2[%c64, %c0_13] : memref<520x128xf32, #tpu.memory_space<vmem>>, vector<32x32xf32>
    %c64_14 = arith.constant 64 : index
    %c32_15 = arith.constant 32 : index
    %43 = vector.load %arg2[%c64_14, %c32_15] : memref<520x128xf32, #tpu.memory_space<vmem>>, vector<32x64xf32>
    %c96 = arith.constant 96 : index
    %c0_16 = arith.constant 0 : index
    %44 = vector.load %arg2[%c96, %c0_16] : memref<520x128xf32, #tpu.memory_space<vmem>>, vector<32x32xf32>
    %c128 = arith.constant 128 : index
    %c0_17 = arith.constant 0 : index
    %45 = vector.load %arg2[%c128, %c0_17] : memref<520x128xf32, #tpu.memory_space<vmem>>, vector<32x64xf32>
    %c160 = arith.constant 160 : index
    %c0_18 = arith.constant 0 : index
    %46 = vector.load %arg2[%c160, %c0_18] : memref<520x128xf32, #tpu.memory_space<vmem>>, vector<64x32xf32>
    %c224 = arith.constant 224 : index
    %c0_19 = arith.constant 0 : index
    %47 = vector.load %arg2[%c224, %c0_19] : memref<520x128xf32, #tpu.memory_space<vmem>>, vector<1x96xf32>
    %c225 = arith.constant 225 : index
    %c0_20 = arith.constant 0 : index
    %48 = vector.load %arg2[%c225, %c0_20] : memref<520x128xf32, #tpu.memory_space<vmem>>, vector<1x32xf32>
    %c226 = arith.constant 226 : index
    %c0_21 = arith.constant 0 : index
    %49 = vector.load %arg2[%c226, %c0_21] : memref<520x128xf32, #tpu.memory_space<vmem>>, vector<1x32xf32>
    %c226_22 = arith.constant 226 : index
    %c32_23 = arith.constant 32 : index
    %50 = vector.load %arg2[%c226_22, %c32_23] : memref<520x128xf32, #tpu.memory_space<vmem>>, vector<1x64xf32>
    %c227 = arith.constant 227 : index
    %c0_24 = arith.constant 0 : index
    %51 = vector.load %arg2[%c227, %c0_24] : memref<520x128xf32, #tpu.memory_space<vmem>>, vector<1x32xf32>
    %c228 = arith.constant 228 : index
    %c0_25 = arith.constant 0 : index
    %52 = vector.load %arg2[%c228, %c0_25] : memref<520x128xf32, #tpu.memory_space<vmem>>, vector<1x64xf32>
    %c229 = arith.constant 229 : index
    %c0_26 = arith.constant 0 : index
    %53 = vector.load %arg2[%c229, %c0_26] : memref<520x128xf32, #tpu.memory_space<vmem>>, vector<1x32xf32>
    %c230 = arith.constant 230 : index
    %c0_27 = arith.constant 0 : index
    %54 = vector.load %arg2[%c230, %c0_27] : memref<520x128xf32, #tpu.memory_space<vmem>>, vector<1x32xf32>
    %c231 = arith.constant 231 : index
    %c0_28 = arith.constant 0 : index
    %55 = vector.load %arg2[%c231, %c0_28] : memref<520x128xf32, #tpu.memory_space<vmem>>, vector<1x32xf32>
    %c232 = arith.constant 232 : index
    %c0_29 = arith.constant 0 : index
    %56 = vector.load %arg2[%c232, %c0_29] : memref<520x128xf32, #tpu.memory_space<vmem>>, vector<1x32xf32>
    %c233 = arith.constant 233 : index
    %c0_30 = arith.constant 0 : index
    %57 = vector.load %arg2[%c233, %c0_30] : memref<520x128xf32, #tpu.memory_space<vmem>>, vector<1x32xf32>
    %c234 = arith.constant 234 : index
    %c0_31 = arith.constant 0 : index
    %58 = vector.load %arg2[%c234, %c0_31] : memref<520x128xf32, #tpu.memory_space<vmem>>, vector<1x32xf32>
    %c235 = arith.constant 235 : index
    %c0_32 = arith.constant 0 : index
    %59 = vector.load %arg2[%c235, %c0_32] : memref<520x128xf32, #tpu.memory_space<vmem>>, vector<1x32xf32>
    %c240 = arith.constant 240 : index
    %c0_33 = arith.constant 0 : index
    %60 = vector.load %arg2[%c240, %c0_33] : memref<520x128xf32, #tpu.memory_space<vmem>>, vector<32x96xf32>
    %c272 = arith.constant 272 : index
    %c0_34 = arith.constant 0 : index
    %61 = vector.load %arg2[%c272, %c0_34] : memref<520x128xf32, #tpu.memory_space<vmem>>, vector<32x32xf32>
    %c304 = arith.constant 304 : index
    %c0_35 = arith.constant 0 : index
    %62 = vector.load %arg2[%c304, %c0_35] : memref<520x128xf32, #tpu.memory_space<vmem>>, vector<32x32xf32>
    %c304_36 = arith.constant 304 : index
    %c32_37 = arith.constant 32 : index
    %63 = vector.load %arg2[%c304_36, %c32_37] : memref<520x128xf32, #tpu.memory_space<vmem>>, vector<32x64xf32>
    %c336 = arith.constant 336 : index
    %c0_38 = arith.constant 0 : index
    %64 = vector.load %arg2[%c336, %c0_38] : memref<520x128xf32, #tpu.memory_space<vmem>>, vector<32x32xf32>
    %c368 = arith.constant 368 : index
    %c0_39 = arith.constant 0 : index
    %65 = vector.load %arg2[%c368, %c0_39] : memref<520x128xf32, #tpu.memory_space<vmem>>, vector<32x64xf32>
    %c400 = arith.constant 400 : index
    %c0_40 = arith.constant 0 : index
    %66 = vector.load %arg2[%c400, %c0_40] : memref<520x128xf32, #tpu.memory_space<vmem>>, vector<64x32xf32>
    %c464 = arith.constant 464 : index
    %c0_41 = arith.constant 0 : index
    %67 = vector.load %arg2[%c464, %c0_41] : memref<520x128xf32, #tpu.memory_space<vmem>>, vector<1x96xf32>
    %c465 = arith.constant 465 : index
    %c0_42 = arith.constant 0 : index
    %68 = vector.load %arg2[%c465, %c0_42] : memref<520x128xf32, #tpu.memory_space<vmem>>, vector<1x32xf32>
    %c466 = arith.constant 466 : index
    %c0_43 = arith.constant 0 : index
    %69 = vector.load %arg2[%c466, %c0_43] : memref<520x128xf32, #tpu.memory_space<vmem>>, vector<1x32xf32>
    %c466_44 = arith.constant 466 : index
    %c32_45 = arith.constant 32 : index
    %70 = vector.load %arg2[%c466_44, %c32_45] : memref<520x128xf32, #tpu.memory_space<vmem>>, vector<1x64xf32>
    %c467 = arith.constant 467 : index
    %c0_46 = arith.constant 0 : index
    %71 = vector.load %arg2[%c467, %c0_46] : memref<520x128xf32, #tpu.memory_space<vmem>>, vector<1x32xf32>
    %c468 = arith.constant 468 : index
    %c0_47 = arith.constant 0 : index
    %72 = vector.load %arg2[%c468, %c0_47] : memref<520x128xf32, #tpu.memory_space<vmem>>, vector<1x64xf32>
    %c469 = arith.constant 469 : index
    %c0_48 = arith.constant 0 : index
    %73 = vector.load %arg2[%c469, %c0_48] : memref<520x128xf32, #tpu.memory_space<vmem>>, vector<1x32xf32>
    %c470 = arith.constant 470 : index
    %c0_49 = arith.constant 0 : index
    %74 = vector.load %arg2[%c470, %c0_49] : memref<520x128xf32, #tpu.memory_space<vmem>>, vector<1x32xf32>
    %c471 = arith.constant 471 : index
    %c0_50 = arith.constant 0 : index
    %75 = vector.load %arg2[%c471, %c0_50] : memref<520x128xf32, #tpu.memory_space<vmem>>, vector<1x32xf32>
    %c472 = arith.constant 472 : index
    %c0_51 = arith.constant 0 : index
    %76 = vector.load %arg2[%c472, %c0_51] : memref<520x128xf32, #tpu.memory_space<vmem>>, vector<1x32xf32>
    %c473 = arith.constant 473 : index
    %c0_52 = arith.constant 0 : index
    %77 = vector.load %arg2[%c473, %c0_52] : memref<520x128xf32, #tpu.memory_space<vmem>>, vector<1x32xf32>
    %c474 = arith.constant 474 : index
    %c0_53 = arith.constant 0 : index
    %78 = vector.load %arg2[%c474, %c0_53] : memref<520x128xf32, #tpu.memory_space<vmem>>, vector<1x32xf32>
    %c475 = arith.constant 475 : index
    %c0_54 = arith.constant 0 : index
    %79 = vector.load %arg2[%c475, %c0_54] : memref<520x128xf32, #tpu.memory_space<vmem>>, vector<1x32xf32>
    %c480 = arith.constant 480 : index
    %c0_55 = arith.constant 0 : index
    %80 = vector.load %arg2[%c480, %c0_55] : memref<520x128xf32, #tpu.memory_space<vmem>>, vector<32x128xf32>
    %c512 = arith.constant 512 : index
    %c0_56 = arith.constant 0 : index
    %81 = vector.load %arg2[%c512, %c0_56] : memref<520x128xf32, #tpu.memory_space<vmem>>, vector<1x128xf32>
    %c0_57 = arith.constant 0 : index
    %c0_58 = arith.constant 0 : index
    %82 = vector.load %arg0[%c0_57, %c0_58] : memref<16x32xf32, #tpu.memory_space<vmem>>, vector<16x32xf32>
    %c0_59 = arith.constant 0 : index
    %c0_60 = arith.constant 0 : index
    %83 = vector.load %arg1[%c0_59, %c0_60] : memref<24x32xf32, #tpu.memory_space<vmem>>, vector<24x32xf32>
    %cst_61 = arith.constant dense<0.000000e+00> : vector<16x96xf32>
    %84 = tpu.matmul %82, %40, %cst_61 {dimension_numbers = #tpu.dot_dimension_numbers<[1], [0], [0], [1], [0, 0, 1, 1], [], []>} : vector<16x32xf32>, vector<32x96xf32>, vector<16x96xf32> -> vector<16x96xf32>
    %85 = vector.broadcast %47 : vector<1x96xf32> to vector<16x96xf32>
    %86 = arith.addf %84, %85 : vector<16x96xf32>
    %87 = vector.extract_strided_slice %86 {offsets = [0, 0], sizes = [16, 32], strides = [1, 1]} : vector<16x96xf32> to vector<16x32xf32>
    %88 = vector.extract_strided_slice %86 {offsets = [0, 32], sizes = [16, 32], strides = [1, 1]} : vector<16x96xf32> to vector<16x32xf32>
    %89 = vector.extract_strided_slice %86 {offsets = [0, 64], sizes = [16, 32], strides = [1, 1]} : vector<16x96xf32> to vector<16x32xf32>
    %90 = tpu.transpose %88, [1, 0] : vector<16x32xf32> -> vector<32x16xf32>
    %91 = vector.extract_strided_slice %87 {offsets = [0, 0], sizes = [16, 16], strides = [1, 1]} : vector<16x32xf32> to vector<16x16xf32>
    %92 = vector.extract_strided_slice %90 {offsets = [0, 0], sizes = [16, 16], strides = [1, 1]} : vector<32x16xf32> to vector<16x16xf32>
    %cst_62 = arith.constant dense<0.000000e+00> : vector<16x16xf32>
    %93 = tpu.matmul %91, %92, %cst_62 {dimension_numbers = #tpu.dot_dimension_numbers<[1], [0], [0], [1], [0, 0, 1, 1], [], []>} : vector<16x16xf32>, vector<16x16xf32>, vector<16x16xf32> -> vector<16x16xf32>
    %cst_63 = arith.constant 2.500000e-01 : f32
    %94 = vector.broadcast %cst_63 : f32 to vector<16x16xf32>
    %95 = arith.mulf %93, %94 : vector<16x16xf32>
    %96 = arith.addf %95, %19 : vector<16x16xf32>
    %cst_64 = arith.constant dense<0xFF800000> : vector<16xf32>
    %97 = vector.multi_reduction <maximumf>, %96, %cst_64 [1] : vector<16x16xf32> to vector<16xf32>
    %98 = vector.shape_cast %97 : vector<16xf32> to vector<16x1xf32>
    %99 = vector.broadcast %98 : vector<16x1xf32> to vector<16x16xf32>
    %100 = arith.subf %96, %99 : vector<16x16xf32>
    %101 = math.exp %100 : vector<16x16xf32>
    %cst_65 = arith.constant dense<0.000000e+00> : vector<16xf32>
    %102 = vector.multi_reduction <add>, %101, %cst_65 [1] : vector<16x16xf32> to vector<16xf32>
    %103 = vector.shape_cast %102 : vector<16xf32> to vector<16x1xf32>
    %104 = tpu.reciprocal %103 {approx = true} : vector<16x1xf32> -> vector<16x1xf32>
    %105 = vector.broadcast %104 : vector<16x1xf32> to vector<16x16xf32>
    %106 = arith.mulf %101, %105 : vector<16x16xf32>
    %107 = vector.extract_strided_slice %89 {offsets = [0, 0], sizes = [16, 16], strides = [1, 1]} : vector<16x32xf32> to vector<16x16xf32>
    %cst_66 = arith.constant dense<0.000000e+00> : vector<16x16xf32>
    %108 = tpu.matmul %106, %107, %cst_66 {dimension_numbers = #tpu.dot_dimension_numbers<[1], [0], [0], [1], [0, 0, 1, 1], [], []>} : vector<16x16xf32>, vector<16x16xf32>, vector<16x16xf32> -> vector<16x16xf32>
    %109 = vector.extract_strided_slice %41 {offsets = [0, 0], sizes = [16, 32], strides = [1, 1]} : vector<32x32xf32> to vector<16x32xf32>
    %cst_67 = arith.constant dense<0.000000e+00> : vector<16x32xf32>
    %110 = tpu.matmul %108, %109, %cst_67 {dimension_numbers = #tpu.dot_dimension_numbers<[1], [0], [0], [1], [0, 0, 1, 1], [], []>} : vector<16x16xf32>, vector<16x32xf32>, vector<16x32xf32> -> vector<16x32xf32>
    %111 = vector.extract_strided_slice %87 {offsets = [0, 16], sizes = [16, 16], strides = [1, 1]} : vector<16x32xf32> to vector<16x16xf32>
    %112 = vector.extract_strided_slice %90 {offsets = [16, 0], sizes = [16, 16], strides = [1, 1]} : vector<32x16xf32> to vector<16x16xf32>
    %cst_68 = arith.constant dense<0.000000e+00> : vector<16x16xf32>
    %113 = tpu.matmul %111, %112, %cst_68 {dimension_numbers = #tpu.dot_dimension_numbers<[1], [0], [0], [1], [0, 0, 1, 1], [], []>} : vector<16x16xf32>, vector<16x16xf32>, vector<16x16xf32> -> vector<16x16xf32>
    %cst_69 = arith.constant 2.500000e-01 : f32
    %114 = vector.broadcast %cst_69 : f32 to vector<16x16xf32>
    %115 = arith.mulf %113, %114 : vector<16x16xf32>
    %116 = arith.addf %115, %19 : vector<16x16xf32>
    %cst_70 = arith.constant dense<0xFF800000> : vector<16xf32>
    %117 = vector.multi_reduction <maximumf>, %116, %cst_70 [1] : vector<16x16xf32> to vector<16xf32>
    %118 = vector.shape_cast %117 : vector<16xf32> to vector<16x1xf32>
    %119 = vector.broadcast %118 : vector<16x1xf32> to vector<16x16xf32>
    %120 = arith.subf %116, %119 : vector<16x16xf32>
    %121 = math.exp %120 : vector<16x16xf32>
    %cst_71 = arith.constant dense<0.000000e+00> : vector<16xf32>
    %122 = vector.multi_reduction <add>, %121, %cst_71 [1] : vector<16x16xf32> to vector<16xf32>
    %123 = vector.shape_cast %122 : vector<16xf32> to vector<16x1xf32>
    %124 = tpu.reciprocal %123 {approx = true} : vector<16x1xf32> -> vector<16x1xf32>
    %125 = vector.broadcast %124 : vector<16x1xf32> to vector<16x16xf32>
    %126 = arith.mulf %121, %125 : vector<16x16xf32>
    %127 = vector.extract_strided_slice %89 {offsets = [0, 16], sizes = [16, 16], strides = [1, 1]} : vector<16x32xf32> to vector<16x16xf32>
    %cst_72 = arith.constant dense<0.000000e+00> : vector<16x16xf32>
    %128 = tpu.matmul %126, %127, %cst_72 {dimension_numbers = #tpu.dot_dimension_numbers<[1], [0], [0], [1], [0, 0, 1, 1], [], []>} : vector<16x16xf32>, vector<16x16xf32>, vector<16x16xf32> -> vector<16x16xf32>
    %129 = vector.extract_strided_slice %41 {offsets = [16, 0], sizes = [16, 32], strides = [1, 1]} : vector<32x32xf32> to vector<16x32xf32>
    %cst_73 = arith.constant dense<0.000000e+00> : vector<16x32xf32>
    %130 = tpu.matmul %128, %129, %cst_73 {dimension_numbers = #tpu.dot_dimension_numbers<[1], [0], [0], [1], [0, 0, 1, 1], [], []>} : vector<16x16xf32>, vector<16x32xf32>, vector<16x32xf32> -> vector<16x32xf32>
    %131 = arith.addf %110, %130 : vector<16x32xf32>
    %132 = vector.broadcast %48 : vector<1x32xf32> to vector<16x32xf32>
    %133 = arith.addf %131, %132 : vector<16x32xf32>
    %134 = arith.addf %82, %133 : vector<16x32xf32>
    %cst_74 = arith.constant dense<0.000000e+00> : vector<16xf32>
    %135 = vector.multi_reduction <add>, %134, %cst_74 [1] : vector<16x32xf32> to vector<16xf32>
    %136 = vector.shape_cast %135 : vector<16xf32> to vector<16x1xf32>
    %cst_75 = arith.constant 3.200000e+01 : f32
    %137 = vector.broadcast %cst_75 : f32 to vector<16x1xf32>
    %138 = arith.divf %136, %137 : vector<16x1xf32>
    %139 = arith.mulf %134, %134 : vector<16x32xf32>
    %cst_76 = arith.constant dense<0.000000e+00> : vector<16xf32>
    %140 = vector.multi_reduction <add>, %139, %cst_76 [1] : vector<16x32xf32> to vector<16xf32>
    %141 = vector.shape_cast %140 : vector<16xf32> to vector<16x1xf32>
    %cst_77 = arith.constant 3.200000e+01 : f32
    %142 = vector.broadcast %cst_77 : f32 to vector<16x1xf32>
    %143 = arith.divf %141, %142 : vector<16x1xf32>
    %144 = arith.mulf %138, %138 : vector<16x1xf32>
    %145 = arith.subf %143, %144 : vector<16x1xf32>
    %146 = vector.broadcast %138 : vector<16x1xf32> to vector<16x32xf32>
    %147 = arith.subf %134, %146 : vector<16x32xf32>
    %cst_78 = arith.constant 9.99999974E-6 : f32
    %148 = vector.broadcast %cst_78 : f32 to vector<16x1xf32>
    %149 = arith.addf %145, %148 : vector<16x1xf32>
    %150 = math.rsqrt %149 : vector<16x1xf32>
    %151 = vector.broadcast %150 : vector<16x1xf32> to vector<16x32xf32>
    %152 = arith.mulf %147, %151 : vector<16x32xf32>
    %153 = vector.broadcast %54 : vector<1x32xf32> to vector<16x32xf32>
    %154 = arith.mulf %152, %153 : vector<16x32xf32>
    %155 = vector.broadcast %55 : vector<1x32xf32> to vector<16x32xf32>
    %156 = arith.addf %154, %155 : vector<16x32xf32>
    %cst_79 = arith.constant dense<0.000000e+00> : vector<16x32xf32>
    %157 = tpu.matmul %156, %42, %cst_79 {dimension_numbers = #tpu.dot_dimension_numbers<[1], [0], [0], [1], [0, 0, 1, 1], [], []>} : vector<16x32xf32>, vector<32x32xf32>, vector<16x32xf32> -> vector<16x32xf32>
    %158 = vector.broadcast %49 : vector<1x32xf32> to vector<16x32xf32>
    %159 = arith.addf %157, %158 : vector<16x32xf32>
    %cst_80 = arith.constant dense<0.000000e+00> : vector<24x64xf32>
    %160 = tpu.matmul %83, %43, %cst_80 {dimension_numbers = #tpu.dot_dimension_numbers<[1], [0], [0], [1], [0, 0, 1, 1], [], []>} : vector<24x32xf32>, vector<32x64xf32>, vector<24x64xf32> -> vector<24x64xf32>
    %161 = vector.broadcast %50 : vector<1x64xf32> to vector<24x64xf32>
    %162 = arith.addf %160, %161 : vector<24x64xf32>
    %163 = vector.extract_strided_slice %162 {offsets = [0, 0], sizes = [24, 32], strides = [1, 1]} : vector<24x64xf32> to vector<24x32xf32>
    %164 = vector.extract_strided_slice %162 {offsets = [0, 32], sizes = [24, 32], strides = [1, 1]} : vector<24x64xf32> to vector<24x32xf32>
    %165 = tpu.transpose %163, [1, 0] : vector<24x32xf32> -> vector<32x24xf32>
    %166 = vector.extract_strided_slice %159 {offsets = [0, 0], sizes = [16, 16], strides = [1, 1]} : vector<16x32xf32> to vector<16x16xf32>
    %167 = vector.extract_strided_slice %165 {offsets = [0, 0], sizes = [16, 24], strides = [1, 1]} : vector<32x24xf32> to vector<16x24xf32>
    %cst_81 = arith.constant dense<0.000000e+00> : vector<16x24xf32>
    %168 = tpu.matmul %166, %167, %cst_81 {dimension_numbers = #tpu.dot_dimension_numbers<[1], [0], [0], [1], [0, 0, 1, 1], [], []>} : vector<16x16xf32>, vector<16x24xf32>, vector<16x24xf32> -> vector<16x24xf32>
    %cst_82 = arith.constant 2.500000e-01 : f32
    %169 = vector.broadcast %cst_82 : f32 to vector<16x24xf32>
    %170 = arith.mulf %168, %169 : vector<16x24xf32>
    %171 = arith.addf %170, %39 : vector<16x24xf32>
    %cst_83 = arith.constant dense<0xFF800000> : vector<16xf32>
    %172 = vector.multi_reduction <maximumf>, %171, %cst_83 [1] : vector<16x24xf32> to vector<16xf32>
    %173 = vector.shape_cast %172 : vector<16xf32> to vector<16x1xf32>
    %174 = vector.broadcast %173 : vector<16x1xf32> to vector<16x24xf32>
    %175 = arith.subf %171, %174 : vector<16x24xf32>
    %176 = math.exp %175 : vector<16x24xf32>
    %cst_84 = arith.constant dense<0.000000e+00> : vector<16xf32>
    %177 = vector.multi_reduction <add>, %176, %cst_84 [1] : vector<16x24xf32> to vector<16xf32>
    %178 = vector.shape_cast %177 : vector<16xf32> to vector<16x1xf32>
    %179 = tpu.reciprocal %178 {approx = true} : vector<16x1xf32> -> vector<16x1xf32>
    %180 = vector.broadcast %179 : vector<16x1xf32> to vector<16x24xf32>
    %181 = arith.mulf %176, %180 : vector<16x24xf32>
    %182 = vector.extract_strided_slice %164 {offsets = [0, 0], sizes = [24, 16], strides = [1, 1]} : vector<24x32xf32> to vector<24x16xf32>
    %cst_85 = arith.constant dense<0.000000e+00> : vector<16x16xf32>
    %183 = tpu.matmul %181, %182, %cst_85 {dimension_numbers = #tpu.dot_dimension_numbers<[1], [0], [0], [1], [0, 0, 1, 1], [], []>} : vector<16x24xf32>, vector<24x16xf32>, vector<16x16xf32> -> vector<16x16xf32>
    %184 = vector.extract_strided_slice %44 {offsets = [0, 0], sizes = [16, 32], strides = [1, 1]} : vector<32x32xf32> to vector<16x32xf32>
    %cst_86 = arith.constant dense<0.000000e+00> : vector<16x32xf32>
    %185 = tpu.matmul %183, %184, %cst_86 {dimension_numbers = #tpu.dot_dimension_numbers<[1], [0], [0], [1], [0, 0, 1, 1], [], []>} : vector<16x16xf32>, vector<16x32xf32>, vector<16x32xf32> -> vector<16x32xf32>
    %186 = vector.extract_strided_slice %159 {offsets = [0, 16], sizes = [16, 16], strides = [1, 1]} : vector<16x32xf32> to vector<16x16xf32>
    %187 = vector.extract_strided_slice %165 {offsets = [16, 0], sizes = [16, 24], strides = [1, 1]} : vector<32x24xf32> to vector<16x24xf32>
    %cst_87 = arith.constant dense<0.000000e+00> : vector<16x24xf32>
    %188 = tpu.matmul %186, %187, %cst_87 {dimension_numbers = #tpu.dot_dimension_numbers<[1], [0], [0], [1], [0, 0, 1, 1], [], []>} : vector<16x16xf32>, vector<16x24xf32>, vector<16x24xf32> -> vector<16x24xf32>
    %cst_88 = arith.constant 2.500000e-01 : f32
    %189 = vector.broadcast %cst_88 : f32 to vector<16x24xf32>
    %190 = arith.mulf %188, %189 : vector<16x24xf32>
    %191 = arith.addf %190, %39 : vector<16x24xf32>
    %cst_89 = arith.constant dense<0xFF800000> : vector<16xf32>
    %192 = vector.multi_reduction <maximumf>, %191, %cst_89 [1] : vector<16x24xf32> to vector<16xf32>
    %193 = vector.shape_cast %192 : vector<16xf32> to vector<16x1xf32>
    %194 = vector.broadcast %193 : vector<16x1xf32> to vector<16x24xf32>
    %195 = arith.subf %191, %194 : vector<16x24xf32>
    %196 = math.exp %195 : vector<16x24xf32>
    %cst_90 = arith.constant dense<0.000000e+00> : vector<16xf32>
    %197 = vector.multi_reduction <add>, %196, %cst_90 [1] : vector<16x24xf32> to vector<16xf32>
    %198 = vector.shape_cast %197 : vector<16xf32> to vector<16x1xf32>
    %199 = tpu.reciprocal %198 {approx = true} : vector<16x1xf32> -> vector<16x1xf32>
    %200 = vector.broadcast %199 : vector<16x1xf32> to vector<16x24xf32>
    %201 = arith.mulf %196, %200 : vector<16x24xf32>
    %202 = vector.extract_strided_slice %164 {offsets = [0, 16], sizes = [24, 16], strides = [1, 1]} : vector<24x32xf32> to vector<24x16xf32>
    %cst_91 = arith.constant dense<0.000000e+00> : vector<16x16xf32>
    %203 = tpu.matmul %201, %202, %cst_91 {dimension_numbers = #tpu.dot_dimension_numbers<[1], [0], [0], [1], [0, 0, 1, 1], [], []>} : vector<16x24xf32>, vector<24x16xf32>, vector<16x16xf32> -> vector<16x16xf32>
    %204 = vector.extract_strided_slice %44 {offsets = [16, 0], sizes = [16, 32], strides = [1, 1]} : vector<32x32xf32> to vector<16x32xf32>
    %cst_92 = arith.constant dense<0.000000e+00> : vector<16x32xf32>
    %205 = tpu.matmul %203, %204, %cst_92 {dimension_numbers = #tpu.dot_dimension_numbers<[1], [0], [0], [1], [0, 0, 1, 1], [], []>} : vector<16x16xf32>, vector<16x32xf32>, vector<16x32xf32> -> vector<16x32xf32>
    %206 = arith.addf %185, %205 : vector<16x32xf32>
    %207 = vector.broadcast %51 : vector<1x32xf32> to vector<16x32xf32>
    %208 = arith.addf %206, %207 : vector<16x32xf32>
    %209 = arith.addf %156, %208 : vector<16x32xf32>
    %cst_93 = arith.constant dense<0.000000e+00> : vector<16xf32>
    %210 = vector.multi_reduction <add>, %209, %cst_93 [1] : vector<16x32xf32> to vector<16xf32>
    %211 = vector.shape_cast %210 : vector<16xf32> to vector<16x1xf32>
    %cst_94 = arith.constant 3.200000e+01 : f32
    %212 = vector.broadcast %cst_94 : f32 to vector<16x1xf32>
    %213 = arith.divf %211, %212 : vector<16x1xf32>
    %214 = arith.mulf %209, %209 : vector<16x32xf32>
    %cst_95 = arith.constant dense<0.000000e+00> : vector<16xf32>
    %215 = vector.multi_reduction <add>, %214, %cst_95 [1] : vector<16x32xf32> to vector<16xf32>
    %216 = vector.shape_cast %215 : vector<16xf32> to vector<16x1xf32>
    %cst_96 = arith.constant 3.200000e+01 : f32
    %217 = vector.broadcast %cst_96 : f32 to vector<16x1xf32>
    %218 = arith.divf %216, %217 : vector<16x1xf32>
    %219 = arith.mulf %213, %213 : vector<16x1xf32>
    %220 = arith.subf %218, %219 : vector<16x1xf32>
    %221 = vector.broadcast %213 : vector<16x1xf32> to vector<16x32xf32>
    %222 = arith.subf %209, %221 : vector<16x32xf32>
    %cst_97 = arith.constant 9.99999974E-6 : f32
    %223 = vector.broadcast %cst_97 : f32 to vector<16x1xf32>
    %224 = arith.addf %220, %223 : vector<16x1xf32>
    %225 = math.rsqrt %224 : vector<16x1xf32>
    %226 = vector.broadcast %225 : vector<16x1xf32> to vector<16x32xf32>
    %227 = arith.mulf %222, %226 : vector<16x32xf32>
    %228 = vector.broadcast %56 : vector<1x32xf32> to vector<16x32xf32>
    %229 = arith.mulf %227, %228 : vector<16x32xf32>
    %230 = vector.broadcast %57 : vector<1x32xf32> to vector<16x32xf32>
    %231 = arith.addf %229, %230 : vector<16x32xf32>
    %cst_98 = arith.constant dense<0.000000e+00> : vector<16x64xf32>
    %232 = tpu.matmul %231, %45, %cst_98 {dimension_numbers = #tpu.dot_dimension_numbers<[1], [0], [0], [1], [0, 0, 1, 1], [], []>} : vector<16x32xf32>, vector<32x64xf32>, vector<16x64xf32> -> vector<16x64xf32>
    %233 = vector.broadcast %52 : vector<1x64xf32> to vector<16x64xf32>
    %234 = arith.addf %232, %233 : vector<16x64xf32>
    %cst_99 = arith.constant 0.000000e+00 : f32
    %235 = vector.broadcast %cst_99 : f32 to vector<16x64xf32>
    %236 = arith.maximumf %234, %235 : vector<16x64xf32>
    %cst_100 = arith.constant dense<0.000000e+00> : vector<16x32xf32>
    %237 = tpu.matmul %236, %46, %cst_100 {dimension_numbers = #tpu.dot_dimension_numbers<[1], [0], [0], [1], [0, 0, 1, 1], [], []>} : vector<16x64xf32>, vector<64x32xf32>, vector<16x32xf32> -> vector<16x32xf32>
    %238 = vector.broadcast %53 : vector<1x32xf32> to vector<16x32xf32>
    %239 = arith.addf %237, %238 : vector<16x32xf32>
    %240 = arith.addf %231, %239 : vector<16x32xf32>
    %cst_101 = arith.constant dense<0.000000e+00> : vector<16xf32>
    %241 = vector.multi_reduction <add>, %240, %cst_101 [1] : vector<16x32xf32> to vector<16xf32>
    %242 = vector.shape_cast %241 : vector<16xf32> to vector<16x1xf32>
    %cst_102 = arith.constant 3.200000e+01 : f32
    %243 = vector.broadcast %cst_102 : f32 to vector<16x1xf32>
    %244 = arith.divf %242, %243 : vector<16x1xf32>
    %245 = arith.mulf %240, %240 : vector<16x32xf32>
    %cst_103 = arith.constant dense<0.000000e+00> : vector<16xf32>
    %246 = vector.multi_reduction <add>, %245, %cst_103 [1] : vector<16x32xf32> to vector<16xf32>
    %247 = vector.shape_cast %246 : vector<16xf32> to vector<16x1xf32>
    %cst_104 = arith.constant 3.200000e+01 : f32
    %248 = vector.broadcast %cst_104 : f32 to vector<16x1xf32>
    %249 = arith.divf %247, %248 : vector<16x1xf32>
    %250 = arith.mulf %244, %244 : vector<16x1xf32>
    %251 = arith.subf %249, %250 : vector<16x1xf32>
    %252 = vector.broadcast %244 : vector<16x1xf32> to vector<16x32xf32>
    %253 = arith.subf %240, %252 : vector<16x32xf32>
    %cst_105 = arith.constant 9.99999974E-6 : f32
    %254 = vector.broadcast %cst_105 : f32 to vector<16x1xf32>
    %255 = arith.addf %251, %254 : vector<16x1xf32>
    %256 = math.rsqrt %255 : vector<16x1xf32>
    %257 = vector.broadcast %256 : vector<16x1xf32> to vector<16x32xf32>
    %258 = arith.mulf %253, %257 : vector<16x32xf32>
    %259 = vector.broadcast %58 : vector<1x32xf32> to vector<16x32xf32>
    %260 = arith.mulf %258, %259 : vector<16x32xf32>
    %261 = vector.broadcast %59 : vector<1x32xf32> to vector<16x32xf32>
    %262 = arith.addf %260, %261 : vector<16x32xf32>
    %cst_106 = arith.constant dense<0.000000e+00> : vector<16x96xf32>
    %263 = tpu.matmul %262, %60, %cst_106 {dimension_numbers = #tpu.dot_dimension_numbers<[1], [0], [0], [1], [0, 0, 1, 1], [], []>} : vector<16x32xf32>, vector<32x96xf32>, vector<16x96xf32> -> vector<16x96xf32>
    %264 = vector.broadcast %67 : vector<1x96xf32> to vector<16x96xf32>
    %265 = arith.addf %263, %264 : vector<16x96xf32>
    %266 = vector.extract_strided_slice %265 {offsets = [0, 0], sizes = [16, 32], strides = [1, 1]} : vector<16x96xf32> to vector<16x32xf32>
    %267 = vector.extract_strided_slice %265 {offsets = [0, 32], sizes = [16, 32], strides = [1, 1]} : vector<16x96xf32> to vector<16x32xf32>
    %268 = vector.extract_strided_slice %265 {offsets = [0, 64], sizes = [16, 32], strides = [1, 1]} : vector<16x96xf32> to vector<16x32xf32>
    %269 = tpu.transpose %267, [1, 0] : vector<16x32xf32> -> vector<32x16xf32>
    %270 = vector.extract_strided_slice %266 {offsets = [0, 0], sizes = [16, 16], strides = [1, 1]} : vector<16x32xf32> to vector<16x16xf32>
    %271 = vector.extract_strided_slice %269 {offsets = [0, 0], sizes = [16, 16], strides = [1, 1]} : vector<32x16xf32> to vector<16x16xf32>
    %cst_107 = arith.constant dense<0.000000e+00> : vector<16x16xf32>
    %272 = tpu.matmul %270, %271, %cst_107 {dimension_numbers = #tpu.dot_dimension_numbers<[1], [0], [0], [1], [0, 0, 1, 1], [], []>} : vector<16x16xf32>, vector<16x16xf32>, vector<16x16xf32> -> vector<16x16xf32>
    %cst_108 = arith.constant 2.500000e-01 : f32
    %273 = vector.broadcast %cst_108 : f32 to vector<16x16xf32>
    %274 = arith.mulf %272, %273 : vector<16x16xf32>
    %275 = arith.addf %274, %19 : vector<16x16xf32>
    %cst_109 = arith.constant dense<0xFF800000> : vector<16xf32>
    %276 = vector.multi_reduction <maximumf>, %275, %cst_109 [1] : vector<16x16xf32> to vector<16xf32>
    %277 = vector.shape_cast %276 : vector<16xf32> to vector<16x1xf32>
    %278 = vector.broadcast %277 : vector<16x1xf32> to vector<16x16xf32>
    %279 = arith.subf %275, %278 : vector<16x16xf32>
    %280 = math.exp %279 : vector<16x16xf32>
    %cst_110 = arith.constant dense<0.000000e+00> : vector<16xf32>
    %281 = vector.multi_reduction <add>, %280, %cst_110 [1] : vector<16x16xf32> to vector<16xf32>
    %282 = vector.shape_cast %281 : vector<16xf32> to vector<16x1xf32>
    %283 = tpu.reciprocal %282 {approx = true} : vector<16x1xf32> -> vector<16x1xf32>
    %284 = vector.broadcast %283 : vector<16x1xf32> to vector<16x16xf32>
    %285 = arith.mulf %280, %284 : vector<16x16xf32>
    %286 = vector.extract_strided_slice %268 {offsets = [0, 0], sizes = [16, 16], strides = [1, 1]} : vector<16x32xf32> to vector<16x16xf32>
    %cst_111 = arith.constant dense<0.000000e+00> : vector<16x16xf32>
    %287 = tpu.matmul %285, %286, %cst_111 {dimension_numbers = #tpu.dot_dimension_numbers<[1], [0], [0], [1], [0, 0, 1, 1], [], []>} : vector<16x16xf32>, vector<16x16xf32>, vector<16x16xf32> -> vector<16x16xf32>
    %288 = vector.extract_strided_slice %61 {offsets = [0, 0], sizes = [16, 32], strides = [1, 1]} : vector<32x32xf32> to vector<16x32xf32>
    %cst_112 = arith.constant dense<0.000000e+00> : vector<16x32xf32>
    %289 = tpu.matmul %287, %288, %cst_112 {dimension_numbers = #tpu.dot_dimension_numbers<[1], [0], [0], [1], [0, 0, 1, 1], [], []>} : vector<16x16xf32>, vector<16x32xf32>, vector<16x32xf32> -> vector<16x32xf32>
    %290 = vector.extract_strided_slice %266 {offsets = [0, 16], sizes = [16, 16], strides = [1, 1]} : vector<16x32xf32> to vector<16x16xf32>
    %291 = vector.extract_strided_slice %269 {offsets = [16, 0], sizes = [16, 16], strides = [1, 1]} : vector<32x16xf32> to vector<16x16xf32>
    %cst_113 = arith.constant dense<0.000000e+00> : vector<16x16xf32>
    %292 = tpu.matmul %290, %291, %cst_113 {dimension_numbers = #tpu.dot_dimension_numbers<[1], [0], [0], [1], [0, 0, 1, 1], [], []>} : vector<16x16xf32>, vector<16x16xf32>, vector<16x16xf32> -> vector<16x16xf32>
    %cst_114 = arith.constant 2.500000e-01 : f32
    %293 = vector.broadcast %cst_114 : f32 to vector<16x16xf32>
    %294 = arith.mulf %292, %293 : vector<16x16xf32>
    %295 = arith.addf %294, %19 : vector<16x16xf32>
    %cst_115 = arith.constant dense<0xFF800000> : vector<16xf32>
    %296 = vector.multi_reduction <maximumf>, %295, %cst_115 [1] : vector<16x16xf32> to vector<16xf32>
    %297 = vector.shape_cast %296 : vector<16xf32> to vector<16x1xf32>
    %298 = vector.broadcast %297 : vector<16x1xf32> to vector<16x16xf32>
    %299 = arith.subf %295, %298 : vector<16x16xf32>
    %300 = math.exp %299 : vector<16x16xf32>
    %cst_116 = arith.constant dense<0.000000e+00> : vector<16xf32>
    %301 = vector.multi_reduction <add>, %300, %cst_116 [1] : vector<16x16xf32> to vector<16xf32>
    %302 = vector.shape_cast %301 : vector<16xf32> to vector<16x1xf32>
    %303 = tpu.reciprocal %302 {approx = true} : vector<16x1xf32> -> vector<16x1xf32>
    %304 = vector.broadcast %303 : vector<16x1xf32> to vector<16x16xf32>
    %305 = arith.mulf %300, %304 : vector<16x16xf32>
    %306 = vector.extract_strided_slice %268 {offsets = [0, 16], sizes = [16, 16], strides = [1, 1]} : vector<16x32xf32> to vector<16x16xf32>
    %cst_117 = arith.constant dense<0.000000e+00> : vector<16x16xf32>
    %307 = tpu.matmul %305, %306, %cst_117 {dimension_numbers = #tpu.dot_dimension_numbers<[1], [0], [0], [1], [0, 0, 1, 1], [], []>} : vector<16x16xf32>, vector<16x16xf32>, vector<16x16xf32> -> vector<16x16xf32>
    %308 = vector.extract_strided_slice %61 {offsets = [16, 0], sizes = [16, 32], strides = [1, 1]} : vector<32x32xf32> to vector<16x32xf32>
    %cst_118 = arith.constant dense<0.000000e+00> : vector<16x32xf32>
    %309 = tpu.matmul %307, %308, %cst_118 {dimension_numbers = #tpu.dot_dimension_numbers<[1], [0], [0], [1], [0, 0, 1, 1], [], []>} : vector<16x16xf32>, vector<16x32xf32>, vector<16x32xf32> -> vector<16x32xf32>
    %310 = arith.addf %289, %309 : vector<16x32xf32>
    %311 = vector.broadcast %68 : vector<1x32xf32> to vector<16x32xf32>
    %312 = arith.addf %310, %311 : vector<16x32xf32>
    %313 = arith.addf %262, %312 : vector<16x32xf32>
    %cst_119 = arith.constant dense<0.000000e+00> : vector<16xf32>
    %314 = vector.multi_reduction <add>, %313, %cst_119 [1] : vector<16x32xf32> to vector<16xf32>
    %315 = vector.shape_cast %314 : vector<16xf32> to vector<16x1xf32>
    %cst_120 = arith.constant 3.200000e+01 : f32
    %316 = vector.broadcast %cst_120 : f32 to vector<16x1xf32>
    %317 = arith.divf %315, %316 : vector<16x1xf32>
    %318 = arith.mulf %313, %313 : vector<16x32xf32>
    %cst_121 = arith.constant dense<0.000000e+00> : vector<16xf32>
    %319 = vector.multi_reduction <add>, %318, %cst_121 [1] : vector<16x32xf32> to vector<16xf32>
    %320 = vector.shape_cast %319 : vector<16xf32> to vector<16x1xf32>
    %cst_122 = arith.constant 3.200000e+01 : f32
    %321 = vector.broadcast %cst_122 : f32 to vector<16x1xf32>
    %322 = arith.divf %320, %321 : vector<16x1xf32>
    %323 = arith.mulf %317, %317 : vector<16x1xf32>
    %324 = arith.subf %322, %323 : vector<16x1xf32>
    %325 = vector.broadcast %317 : vector<16x1xf32> to vector<16x32xf32>
    %326 = arith.subf %313, %325 : vector<16x32xf32>
    %cst_123 = arith.constant 9.99999974E-6 : f32
    %327 = vector.broadcast %cst_123 : f32 to vector<16x1xf32>
    %328 = arith.addf %324, %327 : vector<16x1xf32>
    %329 = math.rsqrt %328 : vector<16x1xf32>
    %330 = vector.broadcast %329 : vector<16x1xf32> to vector<16x32xf32>
    %331 = arith.mulf %326, %330 : vector<16x32xf32>
    %332 = vector.broadcast %74 : vector<1x32xf32> to vector<16x32xf32>
    %333 = arith.mulf %331, %332 : vector<16x32xf32>
    %334 = vector.broadcast %75 : vector<1x32xf32> to vector<16x32xf32>
    %335 = arith.addf %333, %334 : vector<16x32xf32>
    %cst_124 = arith.constant dense<0.000000e+00> : vector<16x32xf32>
    %336 = tpu.matmul %335, %62, %cst_124 {dimension_numbers = #tpu.dot_dimension_numbers<[1], [0], [0], [1], [0, 0, 1, 1], [], []>} : vector<16x32xf32>, vector<32x32xf32>, vector<16x32xf32> -> vector<16x32xf32>
    %337 = vector.broadcast %69 : vector<1x32xf32> to vector<16x32xf32>
    %338 = arith.addf %336, %337 : vector<16x32xf32>
    %cst_125 = arith.constant dense<0.000000e+00> : vector<24x64xf32>
    %339 = tpu.matmul %83, %63, %cst_125 {dimension_numbers = #tpu.dot_dimension_numbers<[1], [0], [0], [1], [0, 0, 1, 1], [], []>} : vector<24x32xf32>, vector<32x64xf32>, vector<24x64xf32> -> vector<24x64xf32>
    %340 = vector.broadcast %70 : vector<1x64xf32> to vector<24x64xf32>
    %341 = arith.addf %339, %340 : vector<24x64xf32>
    %342 = vector.extract_strided_slice %341 {offsets = [0, 0], sizes = [24, 32], strides = [1, 1]} : vector<24x64xf32> to vector<24x32xf32>
    %343 = vector.extract_strided_slice %341 {offsets = [0, 32], sizes = [24, 32], strides = [1, 1]} : vector<24x64xf32> to vector<24x32xf32>
    %344 = tpu.transpose %342, [1, 0] : vector<24x32xf32> -> vector<32x24xf32>
    %345 = vector.extract_strided_slice %338 {offsets = [0, 0], sizes = [16, 16], strides = [1, 1]} : vector<16x32xf32> to vector<16x16xf32>
    %346 = vector.extract_strided_slice %344 {offsets = [0, 0], sizes = [16, 24], strides = [1, 1]} : vector<32x24xf32> to vector<16x24xf32>
    %cst_126 = arith.constant dense<0.000000e+00> : vector<16x24xf32>
    %347 = tpu.matmul %345, %346, %cst_126 {dimension_numbers = #tpu.dot_dimension_numbers<[1], [0], [0], [1], [0, 0, 1, 1], [], []>} : vector<16x16xf32>, vector<16x24xf32>, vector<16x24xf32> -> vector<16x24xf32>
    %cst_127 = arith.constant 2.500000e-01 : f32
    %348 = vector.broadcast %cst_127 : f32 to vector<16x24xf32>
    %349 = arith.mulf %347, %348 : vector<16x24xf32>
    %350 = arith.addf %349, %39 : vector<16x24xf32>
    %cst_128 = arith.constant dense<0xFF800000> : vector<16xf32>
    %351 = vector.multi_reduction <maximumf>, %350, %cst_128 [1] : vector<16x24xf32> to vector<16xf32>
    %352 = vector.shape_cast %351 : vector<16xf32> to vector<16x1xf32>
    %353 = vector.broadcast %352 : vector<16x1xf32> to vector<16x24xf32>
    %354 = arith.subf %350, %353 : vector<16x24xf32>
    %355 = math.exp %354 : vector<16x24xf32>
    %cst_129 = arith.constant dense<0.000000e+00> : vector<16xf32>
    %356 = vector.multi_reduction <add>, %355, %cst_129 [1] : vector<16x24xf32> to vector<16xf32>
    %357 = vector.shape_cast %356 : vector<16xf32> to vector<16x1xf32>
    %358 = tpu.reciprocal %357 {approx = true} : vector<16x1xf32> -> vector<16x1xf32>
    %359 = vector.broadcast %358 : vector<16x1xf32> to vector<16x24xf32>
    %360 = arith.mulf %355, %359 : vector<16x24xf32>
    %361 = vector.extract_strided_slice %343 {offsets = [0, 0], sizes = [24, 16], strides = [1, 1]} : vector<24x32xf32> to vector<24x16xf32>
    %cst_130 = arith.constant dense<0.000000e+00> : vector<16x16xf32>
    %362 = tpu.matmul %360, %361, %cst_130 {dimension_numbers = #tpu.dot_dimension_numbers<[1], [0], [0], [1], [0, 0, 1, 1], [], []>} : vector<16x24xf32>, vector<24x16xf32>, vector<16x16xf32> -> vector<16x16xf32>
    %363 = vector.extract_strided_slice %64 {offsets = [0, 0], sizes = [16, 32], strides = [1, 1]} : vector<32x32xf32> to vector<16x32xf32>
    %cst_131 = arith.constant dense<0.000000e+00> : vector<16x32xf32>
    %364 = tpu.matmul %362, %363, %cst_131 {dimension_numbers = #tpu.dot_dimension_numbers<[1], [0], [0], [1], [0, 0, 1, 1], [], []>} : vector<16x16xf32>, vector<16x32xf32>, vector<16x32xf32> -> vector<16x32xf32>
    %365 = vector.extract_strided_slice %338 {offsets = [0, 16], sizes = [16, 16], strides = [1, 1]} : vector<16x32xf32> to vector<16x16xf32>
    %366 = vector.extract_strided_slice %344 {offsets = [16, 0], sizes = [16, 24], strides = [1, 1]} : vector<32x24xf32> to vector<16x24xf32>
    %cst_132 = arith.constant dense<0.000000e+00> : vector<16x24xf32>
    %367 = tpu.matmul %365, %366, %cst_132 {dimension_numbers = #tpu.dot_dimension_numbers<[1], [0], [0], [1], [0, 0, 1, 1], [], []>} : vector<16x16xf32>, vector<16x24xf32>, vector<16x24xf32> -> vector<16x24xf32>
    %cst_133 = arith.constant 2.500000e-01 : f32
    %368 = vector.broadcast %cst_133 : f32 to vector<16x24xf32>
    %369 = arith.mulf %367, %368 : vector<16x24xf32>
    %370 = arith.addf %369, %39 : vector<16x24xf32>
    %cst_134 = arith.constant dense<0xFF800000> : vector<16xf32>
    %371 = vector.multi_reduction <maximumf>, %370, %cst_134 [1] : vector<16x24xf32> to vector<16xf32>
    %372 = vector.shape_cast %371 : vector<16xf32> to vector<16x1xf32>
    %373 = vector.broadcast %372 : vector<16x1xf32> to vector<16x24xf32>
    %374 = arith.subf %370, %373 : vector<16x24xf32>
    %375 = math.exp %374 : vector<16x24xf32>
    %cst_135 = arith.constant dense<0.000000e+00> : vector<16xf32>
    %376 = vector.multi_reduction <add>, %375, %cst_135 [1] : vector<16x24xf32> to vector<16xf32>
    %377 = vector.shape_cast %376 : vector<16xf32> to vector<16x1xf32>
    %378 = tpu.reciprocal %377 {approx = true} : vector<16x1xf32> -> vector<16x1xf32>
    %379 = vector.broadcast %378 : vector<16x1xf32> to vector<16x24xf32>
    %380 = arith.mulf %375, %379 : vector<16x24xf32>
    %381 = vector.extract_strided_slice %343 {offsets = [0, 16], sizes = [24, 16], strides = [1, 1]} : vector<24x32xf32> to vector<24x16xf32>
    %cst_136 = arith.constant dense<0.000000e+00> : vector<16x16xf32>
    %382 = tpu.matmul %380, %381, %cst_136 {dimension_numbers = #tpu.dot_dimension_numbers<[1], [0], [0], [1], [0, 0, 1, 1], [], []>} : vector<16x24xf32>, vector<24x16xf32>, vector<16x16xf32> -> vector<16x16xf32>
    %383 = vector.extract_strided_slice %64 {offsets = [16, 0], sizes = [16, 32], strides = [1, 1]} : vector<32x32xf32> to vector<16x32xf32>
    %cst_137 = arith.constant dense<0.000000e+00> : vector<16x32xf32>
    %384 = tpu.matmul %382, %383, %cst_137 {dimension_numbers = #tpu.dot_dimension_numbers<[1], [0], [0], [1], [0, 0, 1, 1], [], []>} : vector<16x16xf32>, vector<16x32xf32>, vector<16x32xf32> -> vector<16x32xf32>
    %385 = arith.addf %364, %384 : vector<16x32xf32>
    %386 = vector.broadcast %71 : vector<1x32xf32> to vector<16x32xf32>
    %387 = arith.addf %385, %386 : vector<16x32xf32>
    %388 = arith.addf %335, %387 : vector<16x32xf32>
    %cst_138 = arith.constant dense<0.000000e+00> : vector<16xf32>
    %389 = vector.multi_reduction <add>, %388, %cst_138 [1] : vector<16x32xf32> to vector<16xf32>
    %390 = vector.shape_cast %389 : vector<16xf32> to vector<16x1xf32>
    %cst_139 = arith.constant 3.200000e+01 : f32
    %391 = vector.broadcast %cst_139 : f32 to vector<16x1xf32>
    %392 = arith.divf %390, %391 : vector<16x1xf32>
    %393 = arith.mulf %388, %388 : vector<16x32xf32>
    %cst_140 = arith.constant dense<0.000000e+00> : vector<16xf32>
    %394 = vector.multi_reduction <add>, %393, %cst_140 [1] : vector<16x32xf32> to vector<16xf32>
    %395 = vector.shape_cast %394 : vector<16xf32> to vector<16x1xf32>
    %cst_141 = arith.constant 3.200000e+01 : f32
    %396 = vector.broadcast %cst_141 : f32 to vector<16x1xf32>
    %397 = arith.divf %395, %396 : vector<16x1xf32>
    %398 = arith.mulf %392, %392 : vector<16x1xf32>
    %399 = arith.subf %397, %398 : vector<16x1xf32>
    %400 = vector.broadcast %392 : vector<16x1xf32> to vector<16x32xf32>
    %401 = arith.subf %388, %400 : vector<16x32xf32>
    %cst_142 = arith.constant 9.99999974E-6 : f32
    %402 = vector.broadcast %cst_142 : f32 to vector<16x1xf32>
    %403 = arith.addf %399, %402 : vector<16x1xf32>
    %404 = math.rsqrt %403 : vector<16x1xf32>
    %405 = vector.broadcast %404 : vector<16x1xf32> to vector<16x32xf32>
    %406 = arith.mulf %401, %405 : vector<16x32xf32>
    %407 = vector.broadcast %76 : vector<1x32xf32> to vector<16x32xf32>
    %408 = arith.mulf %406, %407 : vector<16x32xf32>
    %409 = vector.broadcast %77 : vector<1x32xf32> to vector<16x32xf32>
    %410 = arith.addf %408, %409 : vector<16x32xf32>
    %cst_143 = arith.constant dense<0.000000e+00> : vector<16x64xf32>
    %411 = tpu.matmul %410, %65, %cst_143 {dimension_numbers = #tpu.dot_dimension_numbers<[1], [0], [0], [1], [0, 0, 1, 1], [], []>} : vector<16x32xf32>, vector<32x64xf32>, vector<16x64xf32> -> vector<16x64xf32>
    %412 = vector.broadcast %72 : vector<1x64xf32> to vector<16x64xf32>
    %413 = arith.addf %411, %412 : vector<16x64xf32>
    %cst_144 = arith.constant 0.000000e+00 : f32
    %414 = vector.broadcast %cst_144 : f32 to vector<16x64xf32>
    %415 = arith.maximumf %413, %414 : vector<16x64xf32>
    %cst_145 = arith.constant dense<0.000000e+00> : vector<16x32xf32>
    %416 = tpu.matmul %415, %66, %cst_145 {dimension_numbers = #tpu.dot_dimension_numbers<[1], [0], [0], [1], [0, 0, 1, 1], [], []>} : vector<16x64xf32>, vector<64x32xf32>, vector<16x32xf32> -> vector<16x32xf32>
    %417 = vector.broadcast %73 : vector<1x32xf32> to vector<16x32xf32>
    %418 = arith.addf %416, %417 : vector<16x32xf32>
    %419 = arith.addf %410, %418 : vector<16x32xf32>
    %cst_146 = arith.constant dense<0.000000e+00> : vector<16xf32>
    %420 = vector.multi_reduction <add>, %419, %cst_146 [1] : vector<16x32xf32> to vector<16xf32>
    %421 = vector.shape_cast %420 : vector<16xf32> to vector<16x1xf32>
    %cst_147 = arith.constant 3.200000e+01 : f32
    %422 = vector.broadcast %cst_147 : f32 to vector<16x1xf32>
    %423 = arith.divf %421, %422 : vector<16x1xf32>
    %424 = arith.mulf %419, %419 : vector<16x32xf32>
    %cst_148 = arith.constant dense<0.000000e+00> : vector<16xf32>
    %425 = vector.multi_reduction <add>, %424, %cst_148 [1] : vector<16x32xf32> to vector<16xf32>
    %426 = vector.shape_cast %425 : vector<16xf32> to vector<16x1xf32>
    %cst_149 = arith.constant 3.200000e+01 : f32
    %427 = vector.broadcast %cst_149 : f32 to vector<16x1xf32>
    %428 = arith.divf %426, %427 : vector<16x1xf32>
    %429 = arith.mulf %423, %423 : vector<16x1xf32>
    %430 = arith.subf %428, %429 : vector<16x1xf32>
    %431 = vector.broadcast %423 : vector<16x1xf32> to vector<16x32xf32>
    %432 = arith.subf %419, %431 : vector<16x32xf32>
    %cst_150 = arith.constant 9.99999974E-6 : f32
    %433 = vector.broadcast %cst_150 : f32 to vector<16x1xf32>
    %434 = arith.addf %430, %433 : vector<16x1xf32>
    %435 = math.rsqrt %434 : vector<16x1xf32>
    %436 = vector.broadcast %435 : vector<16x1xf32> to vector<16x32xf32>
    %437 = arith.mulf %432, %436 : vector<16x32xf32>
    %438 = vector.broadcast %78 : vector<1x32xf32> to vector<16x32xf32>
    %439 = arith.mulf %437, %438 : vector<16x32xf32>
    %440 = vector.broadcast %79 : vector<1x32xf32> to vector<16x32xf32>
    %441 = arith.addf %439, %440 : vector<16x32xf32>
    %cst_151 = arith.constant dense<0.000000e+00> : vector<16x128xf32>
    %442 = tpu.matmul %441, %80, %cst_151 {dimension_numbers = #tpu.dot_dimension_numbers<[1], [0], [0], [1], [0, 0, 1, 1], [], []>} : vector<16x32xf32>, vector<32x128xf32>, vector<16x128xf32> -> vector<16x128xf32>
    %443 = vector.broadcast %81 : vector<1x128xf32> to vector<16x128xf32>
    %444 = arith.addf %442, %443 : vector<16x128xf32>
    %c0_152 = arith.constant 0 : index
    %c0_153 = arith.constant 0 : index
    %445 = vector.load %arg3[%c0_152, %c0_153] : memref<16x128xf32, #tpu.memory_space<vmem>>, vector<16x128xf32>
    tpu.vector_store %arg3[%c0_152, %c0_153], %444 {strides = array<i32>} : memref<16x128xf32, #tpu.memory_space<vmem>>, vector<16x128xf32>,
    return
  }
}

</mosaic_0001>

<bundles_post_ra>
// kernel: tpu_custom_call.1
= control target key start
LH: loop header
LB: loop body
LE: loop exit
PB: predicated region body
PF: predicated region fallthrough
CT: control target
= control target key end

     0   :  { %8 = vsyncpa [#allocation3], 0  ;;  %s5341_s0 = inlined_call_operand.hbm [shape: f32[16,32], index: 0, kind: input, shape index: {}]   ;;  %s5342_s1 = inlined_call_operand.hbm [shape: f32[24,32], index: 1, kind: input, shape index: {}]   ;;  %s5343_s2 = inlined_call_operand.hbm [shape: f32[520,128], index: 2, kind: input, shape index: {}]   ;;  %s5344_s3 = inlined_call_operand.hbm [shape: f32[16,128], index: 3, kind: output, shape index: {}]  }
   0x1   :  { %9 = vsyncpa [#allocation6], 0 }
   0x2   :  { %10 = vsyncpa [#allocation4], 0  ;;  %s4893_s12 = smov [#allocation5]   ;;  %s4894_s14 = smov [#allocation2]  }
   0x3   :  { %s28_s13 = sshll.u32 %s4893_s12, 4  ;;  %s16_s15 = sshll.u32 %s4894_s14, 4  ;;  %s29_s13 = int_to_ptr.vmem [resolvable:$true] %s28_s13  ;;  %s4928_s15 = int_to_ptr.vmem [resolvable:$true] %s16_s15 }
   0x4   :  { %s4799_s18 = scalar_lea.hbm %s5342_s1, 384 }
   0x5   :  { %p4800_p0 = scmp.ne.s32.totalorder %s5342_s1, %s4799_s18  ;;  %p4803_p1 = scmp.lt.u32.totalorder %s4799_s18, %s5342_s1 }
   0x7   :  { %p4805_p2 = pnand %p4803_p1, %p4800_p0 }
   0x9   :  { %4808 = shalt.err (!%p4805_p2)
}
   0xa   :  { %s4809_s23 = scalar_lea.vmem %s29_s13, 384  ;;  %p4814_p4 = scmp.lt.s32.totalorder %s29_s13, %s29_s13 }
   0xb   :  { %p4810_p3 = scmp.ne.s32.totalorder %s29_s13, %s4809_s23  ;;  %p4815_p5 = scmp.lt.s32.totalorder %s4809_s23, %s4809_s23 }
   0xd   :  { %p4816_p6 = por %p4815_p5, %p4814_p4 }
   0xf   :  { %p4817_p7 = pnand %p4816_p6, %p4810_p3 }
  0x11   :  { %4820 = shalt.err (!%p4817_p7)
}
  0x12   :  { %s4895_s24 = smov 128   ;;  %s4896_s25 = smov 8  }
  0x13   :  { %34 = dma.hbm_to_vmem [thread:$0]  %s5342_s1, 384, %s29_s13, [#allocation6], %s4895_s24, %s4895_s24, %s4896_s25  }
  0x14   :  { %s4821_s30 = scalar_lea.hbm %s5341_s0, 256 }
  0x15   :  { %p4822_p8 = scmp.ne.s32.totalorder %s5341_s0, %s4821_s30  ;;  %p4825_p9 = scmp.lt.u32.totalorder %s4821_s30, %s5341_s0 }
  0x17   :  { %p4827_p10 = pnand %p4825_p9, %p4822_p8 }
  0x19   :  { %4830 = shalt.err (!%p4827_p10)
}
  0x1a   :  { %s4831_s8 = scalar_lea.vmem %s4928_s15, 256  ;;  %p4836_p12 = scmp.lt.s32.totalorder %s4928_s15, %s4928_s15 }
  0x1b   :  { %p4832_p11 = scmp.ne.s32.totalorder %s4928_s15, %s4831_s8  ;;  %p4837_p13 = scmp.lt.s32.totalorder %s4831_s8, %s4831_s8 }
  0x1d   :  { %p4838_p0 = por %p4837_p13, %p4836_p12 }
  0x1f   :  { %p4839_p1 = pnand %p4838_p0, %p4832_p11 }
  0x21   :  { %4842 = shalt.err (!%p4839_p1)
}
  0x22   :  { %22 = dma.hbm_to_vmem [thread:$0]  %s5341_s0, 256, %s4928_s15, [#allocation3], %s4895_s24, %s4895_s24, %s4896_s25  }
  0x23   :  { %s4897_s10 = smov [#allocation7]   ;;  %s4843_s14 = scalar_lea.hbm %s5343_s2, 8320 }
  0x24   :  { %s40_s11 = sshll.u32 %s4897_s10, 4  ;;  %p4844_p2 = scmp.ne.s32.totalorder %s5343_s2, %s4843_s14  ;;  %s41_s11 = int_to_ptr.vmem [resolvable:$true] %s40_s11 }
  0x25   :  { %p4847_p3 = scmp.lt.u32.totalorder %s4843_s14, %s5343_s2 }
  0x27   :  { %p4849_p4 = pnand %p4847_p3, %p4844_p2 }
  0x29   :  { %4852 = shalt.err (!%p4849_p4)
}
  0x2a   :  { %s4853_s20 = scalar_lea.vmem %s41_s11, 8320  ;;  %p4858_p6 = scmp.lt.s32.totalorder %s41_s11, %s41_s11 }
  0x2b   :  { %p4854_p5 = scmp.ne.s32.totalorder %s41_s11, %s4853_s20  ;;  %p4859_p7 = scmp.lt.s32.totalorder %s4853_s20, %s4853_s20 }
  0x2d   :  { %p4860_p8 = por %p4859_p7, %p4858_p6 }
  0x2f   :  { %p4861_p9 = pnand %p4860_p8, %p4854_p5 }
  0x31   :  { %4864 = shalt.err (!%p4861_p9)
}
  0x32   :  { %46 = dma.hbm_to_vmem [thread:$0]  %s5343_s2, 8320, %s41_s11, [#allocation6], %s4895_s24, %s4895_s24, %s4896_s25  }
  0x33   :  { %4887 = dma.done.wait [#allocation3], 256  }
  0x34   :  { %4888 = vsyncadd [#allocation3], 4294967040 }
  0x35   :  { %4889 = dma.done.wait [#allocation6], 8704  }
  0x36   :  { %4890 = vsyncadd [#allocation6], 4294958592  ;;  %vm175_vm0 = vcmask 261120   ;;  %v81_v0 = vld [vmem:[#allocation7] sm:$0xff]  ;;  %v82_v1 = vld [vmem:[#allocation7 + $0x8] sm:$0xff]  ;;  %vm263_vm1 = vcmask 130048   ;;  %v56_v25 = vlaneseq }
  0x37   :  { %v83_v2 = vld [vmem:[#allocation7 + $0x10] sm:$0xff]  ;;  %v4386_v3 = vpack.c.bf16 %v82_v1, %v81_v0  ;;  %v84_v4 = vld [vmem:[#allocation7 + $0x18] sm:$0xff]  ;;  %v4984_v7 = vld [vmem:[#allocation2 + $0x8] sm:$0xff]  ;;  %s4898_s2 = smov 112   ;;  %s4899_s21 = smov 96   ;;  %vm4905_vm5 = vmmov 0  }
  0x38   :  { %v4980_v5 = vld [vmem:[#allocation2] sm:$0xff]  ;;  %v4390_v6 = vpack.c.bf16 %v84_v4, %v83_v2  ;;  %v3756_v8 = vld [vmem:[#allocation7 + $0xe0] ss:$0 sm:$0xff]  ;;  %s4900_s22 = smov 80   ;;  %vm4999_vm2 = vmpackc.low %vm263_vm1, %vm263_vm1  ;;  %v57_v26 = vshrl.u32 %v56_v25, 7  ;;  %v62_v28 = vand.u32 127, %v56_v25 }
  0x39   :  { %4061 = vmatprep.mubr.msk.f32.mxu0 %vm175_vm0, %v4980_v5  ;;  %4387 = vmatprep.subr.bf16.mxu0 %v4386_v3  ;;  %v4901_v45 = vmov -1e+30   ;;  %s4902_s23 = smov 64   ;;  %s4903_s26 = smov 48   ;;  %vm1165_vm6 = vcmask 195584   ;;  %vm1792_vm7 = vcmask 523264  }
  0x3a   :  { %4389 = vmatpush3.bf16.msra.mxu0 %v4386_v3  ;;  %v58_v27 = vadd.s32 8, %v57_v26  ;;  %v63_v30 = vcvt.s32.f32 %v62_v28  ;;  %v59_v31 = vcvt.s32.f32 %v57_v26  ;;  %s4907_s27 = smov [#allocation8]  }
  0x3b   :  { %4391 = vmatprep.subr.bf16.mxu0 %v4390_v6  ;;  %s3743_s28 = sshll.u32 %s4907_s27, 4  ;;  %s3744_s28 = int_to_ptr.vmem [resolvable:$true] %s3743_s28 }
  0x3c   :  { %v60_v29 = vcvt.s32.f32 %v58_v27  ;;  %v73_v33 = vmul.f32 0.125, %v63_v30  ;;  %v65_v34 = vmul.f32 0.125, %v59_v31  ;;  %s4865_s29 = scalar_lea.vmem %s3744_s28, 256  ;;  %p4870_p11 = scmp.lt.s32.totalorder %s3744_s28, %s3744_s28 }
  0x3d   :  { %p4866_p10 = scmp.ne.s32.totalorder %s3744_s28, %s4865_s29  ;;  %p4871_p12 = scmp.lt.s32.totalorder %s4865_s29, %s4865_s29 }
  0x3e   :  { %4393 = vmatpush3.bf16.msra.mxu0 %v4390_v6  ;;  %v66_v32 = vmul.f32 0.125, %v60_v29  ;;  %v74_v36 = vfloor.f32 %v73_v33  ;;  %v67_v37 = vfloor.f32 %v65_v34 }
  0x3f   :  { %p4872_p13 = por %p4871_p12, %p4870_p11 }
  0x40   :  { %v68_v35 = vfloor.f32 %v66_v32  ;;  %v75_v39 = vmul.f32 8.0, %v74_v36  ;;  %v69_v40 = vmul.f32 8.0, %v67_v37 }
  0x41   :  { %4062 = vmatmul.mubr.msk.f32.vlgmr.msra.gmra.mrb[0].mxu0 %vm175_vm0, %v4984_v7  ;;  %p4873_p0 = pnand %p4872_p13, %p4866_p10 }
  0x42   :  { %v70_v38 = vmul.f32 8.0, %v68_v35  ;;  %v76_v42 = vsub.f32 %v63_v30, %v75_v39  ;;  %v71_v43 = vsub.f32 %v59_v31, %v69_v40 }
  0x44   :  { %v72_v41 = vsub.f32 %v60_v29, %v70_v38  ;;  %vm77_vm4 = vcmp.eq.f32.partialorder %v71_v43, %v76_v42  ;;  %v88_v43 = vld [vmem:[#allocation7 + $0x38] sm:$0xff] }
  0x45   :  { %v5016_v49 = vsel %vm77_vm4, 0.0, %v4901_v45 }
  0x46   :  { %vm78_vm3 = vcmp.eq.f32.partialorder %v72_v41, %v76_v42  ;;  %v87_v42 = vld [vmem:[#allocation7 + $0x30] sm:$0xff] }
  0x47   :  { %v5014_v46 = vsel %vm78_vm3, 0.0, %v4901_v45  ;;  %v85_v45 = vld [vmem:[#allocation7 + $0x20] sm:$0xff] }
 0x114   :  { %v4063_v9 = vpop.f32.mrb[0].mxu0 }
 0x115   :  { %v254_v10 = vadd.f32 %v4063_v9, %v3756_v8  ;;  %v248_v11 = vpop.f32.mrb[1].mxu0 }
 0x116   :  { %v249_v12 = vadd.f32 %v3756_v8, %v248_v11 }
 0x118   :  { %460 = vrot.lane.b32.xlu1 %v249_v12, %s4898_s2  ;;  %4068 = vmatprep.mubr.msk.f32.mxu1 %vm263_vm1, %v249_v12  ;;  %v4990_v13 = vpack.i.bf16 %v254_v10, %v249_v12 }
 0x11a   :  { %4622 = vrot.lane.b32.xlu0 %v4990_v13, %s4899_s21 }
 0x11c   :  { %462 = vrot.lane.b32.xlu1 %v254_v10, %s4898_s2 }
 0x11e   :  { %4627 = vrot.lane.b32.xlu0 %v4990_v13, %s4900_s22 }
 0x18a   :  { %v461_v23 = vpop.permute.xlu1 %460 }
 0x18c   :  { %v4623_v14 = vpop.permute.xlu0 %4622 }
 0x18d   :  { %v4625_v15 = vunpack.i.h.bf16 %v4623_v14  ;;  %v4624_v16 = vunpack.i.l.bf16 %v4623_v14 }
 0x18e   :  { %v463_v24 = vpop.permute.xlu1 %462 }
 0x18f   :  { %v4394_v18 = vpack.c.bf16 %v4625_v15, %v4624_v16 }
 0x190   :  { %v4628_v19 = vpop.permute.xlu0 %4627 }
 0x191   :  { %v4630_v20 = vunpack.i.h.bf16 %v4628_v19  ;;  %v4629_v21 = vunpack.i.l.bf16 %v4628_v19  ;;  %4396 = vmatprep.subr.msk.bf16.mxu1 %vm4999_vm2, %v4394_v18 }
 0x192   :  { %4399 = vmatpush3.bf16.xpose.msk.msra.mxu1 %vm4999_vm2, %v4394_v18 }
 0x193   :  { %v4404_v22 = vpack.c.bf16 %v4630_v20, %v4629_v21 }
 0x195   :  { %4406 = vmatprep.subr.msk.bf16.mxu1 %vm4999_vm2, %v4404_v22 }
 0x199   :  { %4069 = vmatmul.mubr.msk.f32.vlgmr.msra.gmra.mrb[0].mxu1 %vm263_vm1, %v254_v10 }
 0x19a   :  { %4409 = vmatpush3.bf16.xpose.msk.msra.mxu1 %vm4999_vm2, %v4404_v22  ;;  %4082 = vmatprep.mubr.msk.f32.mxu1 %vm263_vm1, %v461_v23 }
 0x1a1   :  { %4083 = vmatmul.mubr.msk.f32.vlgmr.msra.gmra.mrb[2].mxu1 %vm263_vm1, %v463_v24 }
 0x26c   :  { %v4070_v44 = vpop.f32.mrb[0].mxu1 }
 0x26d   :  { %v348_v47 = vmul.f32 0.25, %v4070_v44  ;;  %v338_v48 = vpop.f32.mrb[1].mxu1  ;;  %v4414_v44 = vpack.c.bf16 %v88_v43, %v87_v42  ;;  %v5076_v43 = vld [vmem:[#allocation5 + $0x8] sm:$0xff] }
 0x26e   :  { %v347_v50 = vmul.f32 0.25, %v338_v48 }
 0x26f   :  { %v350_v51 = vadd.f32 %v348_v47, %v5014_v46  ;;  %v86_v47 = vld [vmem:[#allocation7 + $0x28] sm:$0xff] }
 0x270   :  { %v349_v52 = vadd.f32 %v347_v50, %v5016_v49  ;;  %v4418_v48 = vpack.c.bf16 %v86_v47, %v85_v45  ;;  %v3777_v47 = vld [vmem:[#allocation7 + $0xe7] ss:$0 sm:$0xff] }
 0x271   :  { %v354_v53 = vsel %vm263_vm1, %v350_v51, -inf }
 0x272   :  { %355 = vmax.xlane.f32.xlu1 %v354_v53  ;;  %v351_v54 = vsel %vm263_vm1, %v349_v52, -inf }
 0x273   :  { %352 = vmax.xlane.f32.xlu0 %v351_v54  ;;  %v3775_v54 = vld [vmem:[#allocation7 + $0xe1] ss:$0 sm:$0xff] }
 0x274   :  { %v4084_v55 = vpop.f32.mrb[2].mxu1 }
 0x275   :  { %v542_v56 = vpop.f32.mrb[3].mxu1  ;;  %v552_v57 = vmul.f32 0.25, %v4084_v55 }
 0x276   :  { %v551_v58 = vmul.f32 0.25, %v542_v56 }
 0x277   :  { %v554_v61 = vadd.f32 %v552_v57, %v5014_v46 }
 0x278   :  { %v553_v59 = vadd.f32 %v551_v58, %v5016_v49 }
 0x279   :  { %v558_v62 = vsel %vm263_vm1, %v554_v61, -inf }
 0x27a   :  { %v555_v60 = vsel %vm263_vm1, %v553_v59, -inf }
 0x27b   :  { %556 = vmax.xlane.f32.xlu0 %v555_v60 }
 0x27f   :  { %559 = vmax.xlane.f32.xlu0 %v558_v62 }
 0x2ff   :  { %v356_v63 = vpop.xlane.xlu1 %355 }
 0x300   :  { %v358_v0 = vsub.f32 %v350_v51, %v356_v63  ;;  %v353_v1 = vpop.xlane.xlu0 %352 }
 0x301   :  { %v357_v2 = vsub.f32 %v349_v52, %v353_v1  ;;  %v89_v1 = vld [vmem:[#allocation7 + $0x40] sm:$0xff] }
 0x302   :  { %v361_v3 = vmul.f32 1.442695, %v358_v0 }
 0x303   :  { %v359_v4 = vmul.f32 1.442695, %v357_v2  ;;  %v90_v2 = vld [vmem:[#allocation7 + $0x48] sm:$0xff] }
 0x304   :  { %4711 = vpow2.f32 %v361_v3  ;;  %v4641_v3 = vpack.i.bf16 %v90_v2, %v89_v1 }
 0x305   :  { %4713 = vpow2.f32 %v359_v4  ;;  %v91_v4 = vld [vmem:[#allocation7 + $0x50] sm:$0xff] }
 0x308   :  { %v557_v6 = vpop.xlane.xlu0 %556 }
 0x309   :  { %v561_v8 = vsub.f32 %v553_v59, %v557_v6  ;;  %v92_v6 = vld [vmem:[#allocation7 + $0x58] sm:$0xff] }
 0x30b   :  { %v563_v9 = vmul.f32 1.442695, %v561_v8  ;;  %v4646_v8 = vpack.i.bf16 %v92_v6, %v91_v4 }
 0x30c   :  { %v560_v10 = vpop.xlane.xlu0 %559 }
 0x30d   :  { %4715 = vpow2.f32 %v563_v9  ;;  %v562_v11 = vsub.f32 %v554_v61, %v560_v10  ;;  %v4904_v9 = vmov 0.0|0.0   ;;  %v4906_v10 = vmov 0.0  }
 0x30e   :  { %v4712_v12 = vpop.eup %4711 }
 0x30f   :  { %v4714_v14 = vpop.eup %4713  ;;  %v565_v15 = vmul.f32 1.442695, %v562_v11  ;;  %v366_v16 = vsel %vm263_vm1, %v4712_v12, 0.0  ;;  %v4422_v11 = vpack.c.bf16 %v90_v2, %v89_v1 }
 0x310   :  { %367 = vadd.xlane.f32.xlu0 %v366_v16  ;;  %v363_v18 = vsel %vm263_vm1, %v4714_v14, 0.0 }
 0x311   :  { %4717 = vpow2.f32 %v565_v15  ;;  %364 = vadd.xlane.f32.xlu1 %v363_v18  ;;  %4423 = vmatprep.subr.bf16.mxu1 %v4422_v11 }
 0x312   :  { %4425 = vmatpush3.bf16.msra.mxu1 %v4422_v11 }
 0x317   :  { %v4716_v19 = vpop.eup %4715 }
 0x318   :  { %v567_v20 = vsel %vm263_vm1, %v4716_v19, 0.0 }
 0x319   :  { %568 = vadd.xlane.f32.xlu1 %v567_v20 }
 0x31b   :  { %v4718_v21 = vpop.eup %4717 }
 0x31c   :  { %v570_v22 = vsel %vm263_vm1, %v4718_v21, 0.0 }
 0x31d   :  { %571 = vadd.xlane.f32.xlu0 %v570_v22 }
 0x32a   :  { %4632 = vrot.lane.b32.xlu1 %v4990_v13, %s4902_s23 }
 0x333   :  { %4637 = vrot.lane.b32.xlu0 %v4990_v13, %s4903_s26 }
 0x39d   :  { %v368_v24 = vpop.xlane.xlu0 %367 }
 0x39e   :  { %v365_v23 = vpop.xlane.xlu1 %364 }
 0x39f   :  { %4719 = vrcp.f32 %v365_v23 }
 0x3a0   :  { %4721 = vrcp.f32 %v368_v24 }
 0x3a6   :  { %v569_v25 = vpop.xlane.xlu1 %568 }
 0x3a7   :  { %4723 = vrcp.f32 %v569_v25 }
 0x3a9   :  { %v4720_v26 = vpop.eup %4719 }
 0x3aa   :  { %v4633_v27 = vpop.permute.xlu1 %4632  ;;  %v572_v28 = vpop.xlane.xlu0 %571  ;;  %v371_v29 = vmul.f32 %v4720_v26, %v4714_v14  ;;  %v5063_v14 = vld [vmem:[#allocation7 + $0xe2] ss:$0 sm:$0xff] }
 0x3ab   :  { %v4635_v30 = vunpack.i.h.bf16 %v4633_v27  ;;  %v4634_v31 = vunpack.i.l.bf16 %v4633_v27  ;;  %4725 = vrcp.f32 %v572_v28  ;;  %v4722_v33 = vpop.eup %4721 }
 0x3ac   :  { %4075 = vmatprep.mubr.msk.f32.mxu0 %vm263_vm1, %v371_v29  ;;  %v372_v37 = vmul.f32 %v4722_v33, %v4712_v12  ;;  %v4426_v12 = vpack.c.bf16 %v92_v6, %v91_v4 }
 0x3ad   :  { %v4400_v32 = vpack.c.bf16 %v4635_v30, %v4634_v31 }
 0x3ae   :  { %v4638_v34 = vpop.permute.xlu0 %4637  ;;  %4427 = vmatprep.subr.bf16.mxu1 %v4426_v12 }
 0x3af   :  { %v4640_v35 = vunpack.i.h.bf16 %v4638_v34  ;;  %v4639_v13 = vunpack.i.l.bf16 %v4638_v34  ;;  %4401 = vmatprep.subr.bf16.mxu0 %v4400_v32  ;;  %4429 = vmatpush3.bf16.msra.mxu1 %v4426_v12 }
 0x3b0   :  { %4403 = vmatpush3.bf16.msra.mxu0 %v4400_v32 }
 0x3b1   :  { %v4724_v36 = vpop.eup %4723  ;;  %v4410_v38 = vpack.c.bf16 %v4640_v35, %v4639_v13 }
 0x3b2   :  { %v575_v39 = vmul.f32 %v4724_v36, %v4716_v19 }
 0x3b3   :  { %4076 = vmatmul.mubr.msk.f32.vlgmr.msra.gmra.mrb[2].mxu0 %vm263_vm1, %v372_v37  ;;  %4411 = vmatprep.subr.bf16.mxu0 %v4410_v38  ;;  %v5068_v37 = vld [vmem:[#allocation5] sm:$0xff] }
 0x3b4   :  { %4413 = vmatpush3.bf16.msra.mxu0 %v4410_v38  ;;  %4089 = vmatprep.mubr.msk.f32.mxu0 %vm263_vm1, %v575_v39 }
 0x3b5   :  { %v4726_v40 = vpop.eup %4725  ;;  %4415 = vmatprep.subr.bf16.mxu0 %v4414_v44 }
 0x3b6   :  { %v576_v41 = vmul.f32 %v4726_v40, %v4718_v21 }
 0x3b8   :  { %4090 = vmatmul.mubr.msk.f32.vlgmr.msra.gmra.mrb[4].mxu0 %vm263_vm1, %v576_v41  ;;  %v3776_v41 = vld [vmem:[#allocation7 + $0xe6] ss:$0 sm:$0xff] }
 0x3b9   :  { %4417 = vmatpush3.bf16.msra.mxu0 %v4414_v44 }
 0x3ba   :  { %4419 = vmatprep.subr.bf16.mxu0 %v4418_v48 }
 0x486   :  { %v4077_v50 = vpop.f32.mrb[2].mxu0 }
 0x487   :  { %v451_v51 = vpop.f32.mrb[3].mxu0 }
 0x48b   :  { %v4091_v52 = vpop.f32.mrb[4].mxu0 }
 0x48c   :  { %v655_v53 = vpop.f32.mrb[5].mxu0 }
 0x48d   :  { %4096 = vmatprep.mubr.msk.f32.mxu0 %vm263_vm1, %v655_v53 }
 0x48e   :  { %4097 = vmatmul.mubr.msk.f32.vlgmr.msra.gmra.mrb[6].mxu0 %vm263_vm1, %v4091_v52 }
 0x48f   :  { %4103 = vmatprep.mubr.msk.f32.mxu0 %vm263_vm1, %v451_v51  ;;  %4421 = vmatpush3.bf16.msra.mxu0 %v4418_v48  ;;  %v5082_v51 = vld [vmem:[#allocation5 + $0x10] sm:$0xff] }
 0x490   :  { %4430 = vmatprep.subr.bf16.mxu0 %v4904_v9 }
 0x496   :  { %4104 = vmatmul.mubr.msk.f32.vlgmr.msra.gmra.mrb[6].mxu0 %vm263_vm1, %v4077_v50 }
 0x497   :  { %4125 = vmatprep.mubr.msk.f32.mxu0 %vm4905_vm5, %v4906_v10 }
 0x569   :  { %v4105_v55 = vpop.f32.mrb[6].mxu0 }
 0x56a   :  { %v831_v56 = vadd.f32 %v4105_v55, %v3775_v54  ;;  %v817_v57 = vpop.f32.mrb[7].mxu0 }
 0x56b   :  { %v830_v58 = vadd.f32 %v3775_v54, %v817_v57 }
 0x56c   :  { %v5043_v59 = vadd.f32 %v831_v56, %v4984_v7 }
 0x56d   :  { %v5046_v60 = vadd.f32 %v830_v58, %v4980_v5 }
 0x56e   :  { %v837_v61 = vsel %vm175_vm0, %v5043_v59, 0.0  ;;  %v844_v62 = vmul.f32 %v5043_v59, %v5043_v59 }
 0x56f   :  { %838 = vadd.xlane.f32.xlu0 %v837_v61  ;;  %v834_v63 = vsel %vm175_vm0, %v5046_v60, 0.0  ;;  %v843_v0 = vmul.f32 %v5046_v60, %v5046_v60 }
 0x570   :  { %835 = vadd.xlane.f32.xlu1 %v834_v63  ;;  %v848_v7 = vsel %vm175_vm0, %v844_v62, 0.0 }
 0x571   :  { %v845_v5 = vsel %vm175_vm0, %v843_v0, 0.0 }
 0x573   :  { %849 = vadd.xlane.f32.xlu0 %v848_v7 }
 0x574   :  { %846 = vadd.xlane.f32.xlu1 %v845_v5 }
 0x585   :  { %4642 = vrot.lane.b32.xlu1 %v4641_v3, %s4899_s21 }
 0x589   :  { %4647 = vrot.lane.b32.xlu0 %v4646_v8, %s4899_s21  ;;  %979 = vrot.lane.b32.xlu1 %v5063_v14, %s4899_s21 }
 0x5fc   :  { %v839_v15 = vpop.xlane.xlu0 %838 }
 0x5fd   :  { %v842_v16 = vmul.f32 0.03125, %v839_v15  ;;  %v836_v18 = vpop.xlane.xlu1 %835 }
 0x5fe   :  { %v841_v19 = vmul.f32 0.03125, %v836_v18 }
 0x5ff   :  { %v854_v21 = vmul.f32 %v842_v16, %v842_v16  ;;  %v858_v38 = vsub.f32 %v5043_v59, %v842_v16 }
 0x600   :  { %v850_v20 = vpop.xlane.xlu0 %849  ;;  %v853_v24 = vmul.f32 %v841_v19, %v841_v19  ;;  %v857_v40 = vsub.f32 %v5046_v60, %v841_v19 }
 0x601   :  { %v852_v22 = vmul.f32 0.03125, %v850_v20  ;;  %v847_v23 = vpop.xlane.xlu1 %846 }
 0x602   :  { %v851_v25 = vmul.f32 0.03125, %v847_v23 }
 0x603   :  { %v856_v26 = vsub.f32 %v852_v22, %v854_v21 }
 0x604   :  { %v855_v27 = vsub.f32 %v851_v25, %v853_v24  ;;  %v4648_v28 = vpop.permute.xlu0 %4647 }
 0x605   :  { %v860_v29 = vadd.f32 1e-05, %v856_v26  ;;  %v4643_v30 = vpop.permute.xlu1 %4642  ;;  %v4650_v31 = vunpack.i.h.bf16 %v4648_v28  ;;  %v4649_v35 = vunpack.i.l.bf16 %v4648_v28 }
 0x606   :  { %v859_v32 = vadd.f32 1e-05, %v855_v27  ;;  %v4645_v33 = vunpack.i.h.bf16 %v4643_v30  ;;  %v4644_v34 = vunpack.i.l.bf16 %v4643_v30 }
 0x607   :  { %4727 = vrsqrt.f32 %v860_v29  ;;  %v4434_v36 = vpack.c.bf16 %v4650_v31, %v4649_v35 }
 0x608   :  { %4729 = vrsqrt.f32 %v859_v32  ;;  %v4431_v13 = vpack.c.bf16 %v4645_v33, %v4644_v34 }
 0x609   :  { %v980_v56 = vpop.permute.xlu1 %979 }
 0x60a   :  { %4432 = vmatpush3.bf16.msra.mxu0 %v4431_v13 }
 0x60b   :  { %4433 = vmatprep.subr.bf16.mxu0 %v4904_v9 }
 0x60e   :  { %4435 = vmatpush3.bf16.msra.mxu0 %v4434_v36 }
 0x611   :  { %v4728_v39 = vpop.eup %4727  ;;  %4126 = vmatmul.mubr.msk.f32.vlgmr.msra.gmra.mrb[8].mxu0 %vm175_vm0, %v5068_v37 }
 0x612   :  { %v4730_v42 = vpop.eup %4729  ;;  %4128 = vmatprep.mubr.msk.f32.mxu0 %vm4905_vm5, %v4906_v10  ;;  %v864_v44 = vmul.f32 %v4728_v39, %v858_v38 }
 0x613   :  { %v863_v45 = vmul.f32 %v4730_v42, %v857_v40 }
 0x614   :  { %v870_v48 = vmul.f32 %v3776_v41, %v864_v44 }
 0x615   :  { %4129 = vmatmul.mubr.msk.f32.gmra.mrb[10].mxu0 %vm175_vm0, %v5076_v43  ;;  %v869_v50 = vmul.f32 %v3776_v41, %v863_v45 }
 0x616   :  { %4131 = vmatprep.mubr.msk.f32.mxu0 %vm4905_vm5, %v4906_v10  ;;  %v5086_v53 = vadd.f32 %v3777_v47, %v870_v48 }
 0x617   :  { %v5084_v52 = vadd.f32 %v3777_v47, %v869_v50 }
 0x619   :  { %4114 = vmatprep.mubr.msk.f32.mxu1 %vm175_vm0, %v5084_v52  ;;  %4132 = vmatmul.mubr.msk.f32.gmra.mrb[12].mxu0 %vm175_vm0, %v5082_v51 }
 0x61a   :  { %4115 = vmatmul.mubr.msk.f32.vlgmr.msra.gmra.mrb[4].mxu1 %vm175_vm0, %v5086_v53 }
 0x6e4   :  { %v1057_v54 = vpop.f32.mrb[8].mxu0 }
 0x6e5   :  { %v4127_v55 = vpop.f32.mrb[9].mxu0  ;;  %v1058_v58 = vadd.f32 %v1057_v54, %v980_v56 }
 0x6e8   :  { %v1062_v57 = vpop.f32.mrb[10].mxu0 }
 0x6e9   :  { %v1063_v59 = vadd.f32 %v1062_v57, %v980_v56  ;;  %v4130_v60 = vpop.f32.mrb[11].mxu0 }
 0x6eb   :  { %v5094_v61 = vpack.i.bf16 %v1063_v59, %v1058_v58  ;;  %v4436_v62 = vpack.c.bf16 %v1063_v59, %v1058_v58 }
 0x6ec   :  { %v1067_v63 = vpop.f32.mrb[12].mxu0 }
 0x6ed   :  { %v5096_v0 = vadd.f32 %v1067_v63, %v980_v56  ;;  %v4116_v7 = vpop.f32.mrb[4].mxu1  ;;  %4652 = vrot.lane.b32.xlu1 %v5094_v61, %s4898_s2  ;;  %4438 = vmatprep.subr.msk.bf16.mxu1 %vm4999_vm2, %v4436_v62  ;;  %v4133_v5 = vpop.f32.mrb[13].mxu0 }
 0x6ee   :  { %v953_v1 = vpop.f32.mrb[5].mxu1  ;;  %4441 = vmatpush3.bf16.xpose.msk.msra.mxu1 %vm4999_vm2, %v4436_v62  ;;  %v959_v3 = vadd.f32 %v4116_v7, %v5063_v14 }
 0x6ef   :  { %v954_v2 = vadd.f32 %v5063_v14, %v953_v1  ;;  %1286 = vrot.lane.b32.xlu0 %v5096_v0, %s4898_s2  ;;  %4138 = vmatprep.subr.msk.mxu1 %vm263_vm1, %v5096_v0 }
 0x6f1   :  { %4140 = vmatprep.mubr.msk.f32.mxu1 %vm263_vm1, %v954_v2  ;;  %1278 = vrot.lane.b32.xlu1 %v954_v2, %s4898_s2 }
 0x6f3   :  { %1280 = vrot.lane.b32.xlu0 %v959_v3, %s4898_s2 }
 0x6f6   :  { %4139 = vmatpush3.xpose.msk.msra.mxu1 %vm263_vm1, %v5096_v0 }
 0x6f9   :  { %4141 = vmatmul.mubr.msk.f32.vlgmr.msra.gmra.mrb[6].mxu1 %vm263_vm1, %v959_v3 }
 0x75f   :  { %v4653_v4 = vpop.permute.xlu1 %4652 }
 0x760   :  { %v4655_v6 = vunpack.i.h.bf16 %v4653_v4  ;;  %v4654_v8 = vunpack.i.l.bf16 %v4653_v4 }
 0x761   :  { %v1287_v14 = vpop.permute.xlu0 %1286 }
 0x762   :  { %v4446_v11 = vpack.c.bf16 %v4655_v6, %v4654_v8  ;;  %v95_v8 = vld [vmem:[#allocation7 + $0x70] sm:$0xff] }
 0x763   :  { %v1279_v12 = vpop.permute.xlu1 %1278 }
 0x764   :  { %4448 = vmatprep.subr.msk.bf16.mxu0 %vm4999_vm2, %v4446_v11  ;;  %4158 = vmatprep.mubr.msk.f32.mxu0 %vm263_vm1, %v1279_v12 }
 0x765   :  { %4451 = vmatpush3.bf16.xpose.msk.msra.mxu0 %vm4999_vm2, %v4446_v11  ;;  %v1281_v15 = vpop.permute.xlu0 %1280  ;;  %v96_v11 = vld [vmem:[#allocation7 + $0x78] sm:$0xff] }
 0x766   :  { %4156 = vmatprep.subr.msk.mxu0 %vm263_vm1, %v1287_v14  ;;  %v4456_v12 = vpack.c.bf16 %v96_v11, %v95_v8 }
 0x76d   :  { %4157 = vmatpush3.xpose.msk.msra.mxu0 %vm263_vm1, %v1287_v14 }
 0x76e   :  { %4457 = vmatprep.subr.bf16.mxu0 %v4456_v12 }
 0x770   :  { %4159 = vmatmul.mubr.msk.f32.vlgmr.msra.gmra.mrb[14].mxu0 %vm263_vm1, %v1281_v15 }
 0x771   :  { %4459 = vmatpush3.bf16.msra.mxu0 %v4456_v12 }
 0x7cc   :  { %v4142_v16 = vpop.f32.mrb[6].mxu1 }
 0x7cd   :  { %v1162_v18 = vmul.f32 0.25, %v4142_v16  ;;  %v1152_v19 = vpop.f32.mrb[7].mxu1 }
 0x7ce   :  { %v1161_v20 = vmul.f32 0.25, %v1152_v19 }
 0x7cf   :  { %v1164_v21 = vadd.f32 %v1162_v18, %v5014_v46 }
 0x7d0   :  { %v1163_v22 = vadd.f32 %v1161_v20, %v5016_v49 }
 0x7d1   :  { %v1169_v23 = vsel %vm1165_vm6, %v1164_v21, -inf }
 0x7d2   :  { %1170 = vmax.xlane.f32.xlu0 %v1169_v23  ;;  %v1166_v24 = vsel %vm1165_vm6, %v1163_v22, -inf }
 0x7d3   :  { %1167 = vmax.xlane.f32.xlu1 %v1166_v24  ;;  %v93_v24 = vld [vmem:[#allocation7 + $0x60] sm:$0xff] }
 0x843   :  { %v4160_v25 = vpop.f32.mrb[14].mxu0 }
 0x844   :  { %v1374_v26 = vmul.f32 0.25, %v4160_v25  ;;  %v1364_v27 = vpop.f32.mrb[15].mxu0  ;;  %v94_v25 = vld [vmem:[#allocation7 + $0x68] sm:$0xff] }
 0x845   :  { %v1373_v28 = vmul.f32 0.25, %v1364_v27 }
 0x846   :  { %v1376_v29 = vadd.f32 %v1374_v26, %v5014_v46  ;;  %v4460_v26 = vpack.c.bf16 %v94_v25, %v93_v24 }
 0x847   :  { %v1375_v30 = vadd.f32 %v1373_v28, %v5016_v49 }
 0x848   :  { %v1380_v31 = vsel %vm1165_vm6, %v1376_v29, -inf  ;;  %4461 = vmatprep.subr.bf16.mxu0 %v4460_v26 }
 0x849   :  { %1381 = vmax.xlane.f32.xlu1 %v1380_v31  ;;  %v1377_v32 = vsel %vm1165_vm6, %v1375_v30, -inf  ;;  %v3802_v31 = vld [vmem:[#allocation7 + $0xe3] ss:$0 sm:$0xff] }
 0x84a   :  { %1378 = vmax.xlane.f32.xlu0 %v1377_v32 }
 0x85a   :  { %1192 = vrot.lane.b32.xlu1 %v5096_v0, %s4899_s21 }
 0x85f   :  { %v1171_v33 = vpop.xlane.xlu0 %1170 }
 0x860   :  { %4657 = vrot.lane.b32.xlu0 %v5094_v61, %s4899_s21  ;;  %v1168_v34 = vpop.xlane.xlu1 %1167  ;;  %v1173_v35 = vsub.f32 %v1164_v21, %v1171_v33 }
 0x861   :  { %v1172_v13 = vsub.f32 %v1163_v22, %v1168_v34 }
 0x862   :  { %v1176_v36 = vmul.f32 1.442695, %v1173_v35 }
 0x863   :  { %v1174_v38 = vmul.f32 1.442695, %v1172_v13 }
 0x864   :  { %4731 = vpow2.f32 %v1176_v36 }
 0x865   :  { %4733 = vpow2.f32 %v1174_v38 }
 0x86e   :  { %v4732_v39 = vpop.eup %4731 }
 0x86f   :  { %v4734_v40 = vpop.eup %4733  ;;  %v1181_v41 = vsel %vm1165_vm6, %v4732_v39, 0.0 }
 0x870   :  { %v1178_v42 = vsel %vm1165_vm6, %v4734_v40, 0.0 }
 0x87e   :  { %1182 = vadd.xlane.f32.xlu1 %v1181_v41 }
 0x87f   :  { %1179 = vadd.xlane.f32.xlu0 %v1178_v42 }
 0x8d6   :  { %v1382_v44 = vpop.xlane.xlu1 %1381 }
 0x8d7   :  { %v1384_v45 = vsub.f32 %v1376_v29, %v1382_v44  ;;  %v1379_v47 = vpop.xlane.xlu0 %1378 }
 0x8d8   :  { %v1383_v48 = vsub.f32 %v1375_v30, %v1379_v47  ;;  %v98_v47 = vld [vmem:[#allocation7 + $0x88] sm:$0xff] }
 0x8d9   :  { %v1387_v50 = vmul.f32 1.442695, %v1384_v45  ;;  %v97_v45 = vld [vmem:[#allocation7 + $0x80] sm:$0xff] }
 0x8da   :  { %v1385_v54 = vmul.f32 1.442695, %v1383_v48  ;;  %v1193_v59 = vpop.permute.xlu1 %1192  ;;  %v99_v48 = vld [vmem:[#allocation7 + $0x90] sm:$0xff] }
 0x8db   :  { %4735 = vpow2.f32 %v1387_v50  ;;  %v4658_v55 = vpop.permute.xlu0 %4657  ;;  %v100_v50 = vld [vmem:[#allocation7 + $0x98] sm:$0xff] }
 0x8dc   :  { %4737 = vpow2.f32 %v1385_v54  ;;  %v4660_v56 = vunpack.i.h.bf16 %v4658_v55  ;;  %v4659_v57 = vunpack.i.l.bf16 %v4658_v55  ;;  %v101_v54 = vld [vmem:[#allocation7 + $0xa0] sm:$0xff]  ;;  %v102_v55 = vld [vmem:[#allocation7 + $0xa8] sm:$0xff] }
 0x8de   :  { %v4442_v58 = vpack.c.bf16 %v4660_v56, %v4659_v57  ;;  %v103_v56 = vld [vmem:[#allocation7 + $0xb0] sm:$0xff]  ;;  %v4472_v57 = vpack.c.bf16 %v102_v55, %v101_v54 }
 0x8e0   :  { %4443 = vmatprep.subr.bf16.mxu1 %v4442_v58 }
 0x8e1   :  { %4445 = vmatpush3.bf16.msra.mxu1 %v4442_v58  ;;  %v104_v58 = vld [vmem:[#allocation7 + $0xb8] sm:$0xff] }
 0x8e2   :  { %4147 = vmatprep.subr.mxu1 %v1193_v59 }
 0x8e5   :  { %v4736_v60 = vpop.eup %4735  ;;  %4148 = vmatpush3.msra.mxu1 %v1193_v59  ;;  %v4476_v59 = vpack.c.bf16 %v104_v58, %v103_v56  ;;  %v121_v56 = vld [vmem:[#allocation7 + $0xf0] sm:$0xff]  ;;  %v123_v58 = vld [vmem:[#allocation7 + $0x100] sm:$0xff] }
 0x8e6   :  { %v4738_v62 = vpop.eup %4737  ;;  %v1392_v63 = vsel %vm1165_vm6, %v4736_v60, 0.0 }
 0x8e7   :  { %1393 = vadd.xlane.f32.xlu1 %v1392_v63  ;;  %v1389_v7 = vsel %vm1165_vm6, %v4738_v62, 0.0 }
 0x8e8   :  { %1390 = vadd.xlane.f32.xlu0 %v1389_v7 }
 0x8f8   :  { %4662 = vrot.lane.b32.xlu1 %v5094_v61, %s4900_s22 }
 0x8fe   :  { %1403 = vrot.lane.b32.xlu0 %v5096_v0, %s4900_s22 }
 0x90b   :  { %v1183_v5 = vpop.xlane.xlu1 %1182 }
 0x90c   :  { %4739 = vrcp.f32 %v1183_v5  ;;  %v1180_v1 = vpop.xlane.xlu0 %1179 }
 0x90d   :  { %4741 = vrcp.f32 %v1180_v1 }
 0x916   :  { %v4740_v2 = vpop.eup %4739 }
 0x917   :  { %v4742_v3 = vpop.eup %4741  ;;  %v1187_v6 = vmul.f32 %v4740_v2, %v4732_v39 }
 0x918   :  { %v1186_v4 = vmul.f32 %v4742_v3, %v4734_v40 }
 0x91a   :  { %4149 = vmatprep.mubr.msk.f32.mxu1 %vm1165_vm6, %v1186_v4 }
 0x91b   :  { %4150 = vmatmul.mubr.msk.f32.vlgmr.msra.gmra.mrb[8].mxu1 %vm1165_vm6, %v1187_v6 }
 0x974   :  { %v1394_v61 = vpop.xlane.xlu1 %1393 }
 0x975   :  { %4743 = vrcp.f32 %v1394_v61  ;;  %v1391_v0 = vpop.xlane.xlu0 %1390 }
 0x976   :  { %4745 = vrcp.f32 %v1391_v0 }
 0x978   :  { %v4663_v14 = vpop.permute.xlu1 %4662 }
 0x979   :  { %v4665_v15 = vunpack.i.h.bf16 %v4663_v14  ;;  %v4664_v16 = vunpack.i.l.bf16 %v4663_v14  ;;  %v1404_v19 = vpop.permute.xlu0 %1403 }
 0x97b   :  { %v4452_v18 = vpack.c.bf16 %v4665_v15, %v4664_v16 }
 0x97d   :  { %4453 = vmatprep.subr.bf16.mxu1 %v4452_v18 }
 0x97e   :  { %4455 = vmatpush3.bf16.msra.mxu1 %v4452_v18 }
 0x97f   :  { %v4744_v20 = vpop.eup %4743  ;;  %4165 = vmatprep.subr.mxu1 %v1404_v19 }
 0x980   :  { %v4746_v21 = vpop.eup %4745  ;;  %v1398_v23 = vmul.f32 %v4744_v20, %v4736_v60  ;;  %v105_v60 = vld [vmem:[#allocation7 + $0xc0] sm:$0xff]  ;;  %v3803_v20 = vld [vmem:[#allocation7 + $0xe8] ss:$0 sm:$0xff] }
 0x981   :  { %v1397_v22 = vmul.f32 %v4746_v21, %v4738_v62  ;;  %v106_v62 = vld [vmem:[#allocation7 + $0xc8] sm:$0xff] }
 0x982   :  { %4166 = vmatpush3.msra.mxu1 %v1404_v19  ;;  %v4480_v63 = vpack.c.bf16 %v106_v62, %v105_v60  ;;  %v124_v60 = vld [vmem:[#allocation7 + $0x108] sm:$0xff] }
 0x983   :  { %4167 = vmatprep.mubr.msk.f32.mxu1 %vm1165_vm6, %v1397_v22  ;;  %v4492_v62 = vpack.c.bf16 %v124_v60, %v123_v58 }
 0x984   :  { %4168 = vmatmul.mubr.msk.f32.vlgmr.msra.gmra.mrb[10].mxu1 %vm1165_vm6, %v1398_v23  ;;  %v3804_v23 = vld [vmem:[#allocation7 + $0xe9] ss:$0 sm:$0xff] }
 0x9ee   :  { %v4151_v27 = vpop.f32.mrb[8].mxu1 }
 0x9ef   :  { %v1269_v28 = vpop.f32.mrb[9].mxu1 }
 0xa57   :  { %v4169_v29 = vpop.f32.mrb[10].mxu1 }
 0xa58   :  { %v1480_v30 = vpop.f32.mrb[11].mxu1 }
 0xa59   :  { %4174 = vmatprep.mubr.msk.f32.mxu0 %vm263_vm1, %v1480_v30  ;;  %v108_v30 = vld [vmem:[#allocation7 + $0xd8] sm:$0xff] }
 0xa5a   :  { %4175 = vmatmul.mubr.msk.f32.vlgmr.msra.gmra.mrb[16].mxu0 %vm263_vm1, %v4169_v29  ;;  %v107_v29 = vld [vmem:[#allocation7 + $0xd0] sm:$0xff] }
 0xa5b   :  { %4181 = vmatprep.mubr.msk.f32.mxu0 %vm263_vm1, %v1269_v28  ;;  %4463 = vmatpush3.bf16.msra.mxu0 %v4460_v26 }
 0xa5c   :  { %4473 = vmatprep.subr.bf16.mxu0 %v4472_v57 }
 0xa62   :  { %4182 = vmatmul.mubr.msk.f32.vlgmr.msra.gmra.mrb[16].mxu0 %vm263_vm1, %v4151_v27 }
 0xa63   :  { %4475 = vmatpush3.bf16.msra.mxu0 %v4472_v57  ;;  %v122_v57 = vld [vmem:[#allocation7 + $0xf8] sm:$0xff] }
 0xa64   :  { %4477 = vmatprep.subr.bf16.mxu0 %v4476_v59 }
 0xa67   :  { %4479 = vmatpush3.bf16.msra.mxu0 %v4476_v59  ;;  %v4488_v59 = vpack.c.bf16 %v122_v57, %v121_v56 }
 0xa68   :  { %4481 = vmatprep.subr.bf16.mxu0 %v4480_v63 }
 0xa6b   :  { %4483 = vmatpush3.bf16.msra.mxu0 %v4480_v63 }
 0xb35   :  { %v4183_v32 = vpop.f32.mrb[16].mxu0 }
 0xb36   :  { %v1656_v33 = vadd.f32 %v4183_v32, %v3802_v31  ;;  %v1642_v34 = vpop.f32.mrb[17].mxu0  ;;  %v3805_v32 = vld [vmem:[#allocation7 + $0xe4] ss:$0 sm:$0xff] }
 0xb37   :  { %v1655_v35 = vadd.f32 %v3802_v31, %v1642_v34  ;;  %v4484_v31 = vpack.c.bf16 %v108_v30, %v107_v29 }
 0xb38   :  { %v1658_v13 = vadd.f32 %v1656_v33, %v5086_v53  ;;  %v4464_v53 = vpack.c.bf16 %v98_v47, %v97_v45 }
 0xb39   :  { %v1657_v36 = vadd.f32 %v1655_v35, %v5084_v52  ;;  %v4468_v52 = vpack.c.bf16 %v100_v50, %v99_v48  ;;  %4485 = vmatprep.subr.bf16.mxu0 %v4484_v31 }
 0xb3a   :  { %v1662_v38 = vsel %vm175_vm0, %v1658_v13, 0.0  ;;  %v1668_v41 = vmul.f32 %v1658_v13, %v1658_v13  ;;  %4465 = vmatprep.subr.bf16.mxu1 %v4464_v53  ;;  %4487 = vmatpush3.bf16.msra.mxu0 %v4484_v31 }
 0xb3b   :  { %1663 = vadd.xlane.f32.xlu0 %v1662_v38  ;;  %v1659_v39 = vsel %vm175_vm0, %v1657_v36, 0.0  ;;  %v1667_v40 = vmul.f32 %v1657_v36, %v1657_v36  ;;  %4467 = vmatpush3.bf16.msra.mxu1 %v4464_v53 }
 0xb3c   :  { %1660 = vadd.xlane.f32.xlu1 %v1659_v39  ;;  %v1672_v44 = vsel %vm175_vm0, %v1668_v41, 0.0  ;;  %4469 = vmatprep.subr.bf16.mxu1 %v4468_v52  ;;  %v3808_v39 = vld [vmem:[#allocation7 + $0xe5] ss:$0 sm:$0xff] }
 0xb3d   :  { %v1669_v42 = vsel %vm175_vm0, %v1667_v40, 0.0 }
 0xb3f   :  { %1670 = vadd.xlane.f32.xlu0 %v1669_v42  ;;  %4471 = vmatpush3.bf16.msra.mxu1 %v4468_v52 }
 0xb40   :  { %1673 = vadd.xlane.f32.xlu1 %v1672_v44  ;;  %4489 = vmatprep.subr.bf16.mxu1 %v4488_v59 }
 0xbc8   :  { %v1664_v7 = vpop.xlane.xlu0 %1663 }
 0xbc9   :  { %v1661_v5 = vpop.xlane.xlu1 %1660  ;;  %v1666_v1 = vmul.f32 0.03125, %v1664_v7 }
 0xbca   :  { %v1665_v2 = vmul.f32 0.03125, %v1661_v5 }
 0xbcb   :  { %v1678_v11 = vmul.f32 %v1666_v1, %v1666_v1  ;;  %v1682_v19 = vsub.f32 %v1658_v13, %v1666_v1 }
 0xbcc   :  { %v1677_v3 = vmul.f32 %v1665_v2, %v1665_v2  ;;  %v1671_v4 = vpop.xlane.xlu0 %1670  ;;  %v1681_v16 = vsub.f32 %v1657_v36, %v1665_v2 }
 0xbcd   :  { %v1675_v6 = vmul.f32 0.03125, %v1671_v4  ;;  %v1674_v8 = vpop.xlane.xlu1 %1673 }
 0xbce   :  { %v1676_v12 = vmul.f32 0.03125, %v1674_v8 }
 0xbcf   :  { %v1679_v61 = vsub.f32 %v1675_v6, %v1677_v3 }
 0xbd0   :  { %v1680_v0 = vsub.f32 %v1676_v12, %v1678_v11 }
 0xbd1   :  { %v1683_v14 = vadd.f32 1e-05, %v1679_v61 }
 0xbd2   :  { %v1684_v15 = vadd.f32 1e-05, %v1680_v0 }
 0xbd3   :  { %4747 = vrsqrt.f32 %v1683_v14 }
 0xbd4   :  { %4749 = vrsqrt.f32 %v1684_v15 }
 0xbdd   :  { %v4748_v18 = vpop.eup %4747 }
 0xbde   :  { %v4750_v21 = vpop.eup %4749  ;;  %v1687_v22 = vmul.f32 %v4748_v18, %v1681_v16 }
 0xbdf   :  { %v1688_v24 = vmul.f32 %v4750_v21, %v1682_v19  ;;  %v3811_v19 = vld [vmem:[#allocation7 + $0xea] ss:$0 sm:$0xff] }
 0xbe0   :  { %v1693_v25 = vmul.f32 %v3803_v20, %v1687_v22 }
 0xbe1   :  { %v1694_v26 = vmul.f32 %v3803_v20, %v1688_v24 }
 0xbe2   :  { %v1699_v27 = vadd.f32 %v3804_v23, %v1693_v25 }
 0xbe3   :  { %v1700_v28 = vadd.f32 %v3804_v23, %v1694_v26  ;;  %v3812_v23 = vld [vmem:[#allocation7 + $0xeb] ss:$0 sm:$0xff] }
 0xbe4   :  { %4192 = vmatprep.mubr.msk.f32.mxu1 %vm175_vm0, %v1699_v27 }
 0xbe5   :  { %4193 = vmatmul.mubr.msk.f32.vlgmr.msra.gmra.mrb[12].mxu1 %vm175_vm0, %v1700_v28 }
 0xbe6   :  { %4491 = vmatpush3.bf16.msra.mxu1 %v4488_v59 }
 0xbe7   :  { %4493 = vmatprep.subr.bf16.mxu1 %v4492_v62 }
 0xbea   :  { %4495 = vmatpush3.bf16.msra.mxu1 %v4492_v62 }
 0xcb8   :  { %v4194_v33 = vpop.f32.mrb[12].mxu1 }
 0xcb9   :  { %v1783_v34 = vadd.f32 %v4194_v33, %v3805_v32  ;;  %v1777_v35 = vpop.f32.mrb[13].mxu1 }
 0xcba   :  { %v1778_v13 = vadd.f32 %v3805_v32, %v1777_v35 }
 0xcbb   :  { %v1787_v38 = vmax.f32 %v1783_v34, 0.0 }
 0xcbc   :  { %v1786_v36 = vmax.f32 %v1778_v13, 0.0 }
 0xcbe   :  { %4211 = vmatprep.mubr.msk.f32.mxu0 %vm1792_vm7, %v1786_v36 }
 0xcbf   :  { %4212 = vmatmul.mubr.msk.f32.vlgmr.msra.gmra.mrb[18].mxu0 %vm1792_vm7, %v1787_v38 }
 0xd92   :  { %v4213_v40 = vpop.f32.mrb[18].mxu0 }
 0xd93   :  { %v1871_v41 = vadd.f32 %v4213_v40, %v3808_v39  ;;  %v1865_v42 = vpop.f32.mrb[19].mxu0 }
 0xd94   :  { %v1866_v44 = vadd.f32 %v3808_v39, %v1865_v42 }
 0xd95   :  { %v1875_v45 = vadd.f32 %v1871_v41, %v1700_v28  ;;  %v3813_v28 = vld [vmem:[#allocation7 + $0x1d0] ss:$0 sm:$0xff] }
 0xd96   :  { %v1874_v47 = vadd.f32 %v1866_v44, %v1699_v27 }
 0xd97   :  { %v1879_v48 = vsel %vm175_vm0, %v1875_v45, 0.0  ;;  %v1885_v53 = vmul.f32 %v1875_v45, %v1875_v45 }
 0xd98   :  { %1880 = vadd.xlane.f32.xlu1 %v1879_v48  ;;  %v1876_v50 = vsel %vm175_vm0, %v1874_v47, 0.0  ;;  %v1884_v52 = vmul.f32 %v1874_v47, %v1874_v47 }
 0xd99   :  { %1877 = vadd.xlane.f32.xlu0 %v1876_v50  ;;  %v1889_v54 = vsel %vm175_vm0, %v1885_v53, 0.0 }
 0xd9a   :  { %v1886_v55 = vsel %vm175_vm0, %v1884_v52, 0.0 }
 0xd9c   :  { %1890 = vadd.xlane.f32.xlu1 %v1889_v54 }
 0xd9d   :  { %1887 = vadd.xlane.f32.xlu0 %v1886_v55 }
 0xe25   :  { %v1881_v63 = vpop.xlane.xlu1 %1880 }
 0xe26   :  { %v1883_v7 = vmul.f32 0.03125, %v1881_v63  ;;  %v1878_v5 = vpop.xlane.xlu0 %1877 }
 0xe27   :  { %v1882_v1 = vmul.f32 0.03125, %v1878_v5 }
 0xe28   :  { %v1895_v3 = vmul.f32 %v1883_v7, %v1883_v7  ;;  %v1899_v15 = vsub.f32 %v1875_v45, %v1883_v7 }
 0xe29   :  { %v1891_v2 = vpop.xlane.xlu1 %1890  ;;  %v1894_v8 = vmul.f32 %v1882_v1, %v1882_v1  ;;  %v1898_v18 = vsub.f32 %v1874_v47, %v1882_v1 }
 0xe2a   :  { %v1893_v4 = vmul.f32 0.03125, %v1891_v2  ;;  %v1888_v6 = vpop.xlane.xlu0 %1887 }
 0xe2b   :  { %v1892_v11 = vmul.f32 0.03125, %v1888_v6 }
 0xe2c   :  { %v1897_v12 = vsub.f32 %v1893_v4, %v1895_v3 }
 0xe2d   :  { %v1896_v61 = vsub.f32 %v1892_v11, %v1894_v8 }
 0xe2e   :  { %v1901_v0 = vadd.f32 1e-05, %v1897_v12 }
 0xe2f   :  { %v1900_v14 = vadd.f32 1e-05, %v1896_v61 }
 0xe30   :  { %4751 = vrsqrt.f32 %v1901_v0 }
 0xe31   :  { %4753 = vrsqrt.f32 %v1900_v14 }
 0xe3a   :  { %v4752_v16 = vpop.eup %4751 }
 0xe3b   :  { %v4754_v20 = vpop.eup %4753  ;;  %v1905_v21 = vmul.f32 %v4752_v16, %v1899_v15 }
 0xe3c   :  { %v1904_v22 = vmul.f32 %v4754_v20, %v1898_v18 }
 0xe3d   :  { %v1911_v24 = vmul.f32 %v3811_v19, %v1905_v21 }
 0xe3e   :  { %v1910_v25 = vmul.f32 %v3811_v19, %v1904_v22 }
 0xe3f   :  { %v5168_v27 = vadd.f32 %v3812_v23, %v1911_v24 }
 0xe40   :  { %v5166_v26 = vadd.f32 %v3812_v23, %v1910_v25 }
 0xe42   :  { %4222 = vmatprep.mubr.msk.f32.mxu1 %vm175_vm0, %v5166_v26 }
 0xe43   :  { %4223 = vmatmul.mubr.msk.f32.vlgmr.msra.gmra.mrb[14].mxu1 %vm175_vm0, %v5168_v27 }
 0xf16   :  { %v4224_v29 = vpop.f32.mrb[14].mxu1 }
 0xf17   :  { %v2000_v30 = vadd.f32 %v4224_v29, %v3813_v28  ;;  %v1994_v31 = vpop.f32.mrb[15].mxu1 }
 0xf18   :  { %v1995_v32 = vadd.f32 %v3813_v28, %v1994_v31 }
 0xf1a   :  { %4229 = vmatprep.mubr.msk.f32.mxu1 %vm263_vm1, %v1995_v32  ;;  %v5175_v33 = vpack.i.bf16 %v2000_v30, %v1995_v32 }
 0xf1c   :  { %4667 = vrot.lane.b32.xlu0 %v5175_v33, %s4899_s21 }
 0xf20   :  { %4677 = vrot.lane.b32.xlu0 %v5175_v33, %s4900_s22 }
 0xf24   :  { %2205 = vrot.lane.b32.xlu0 %v1995_v32, %s4898_s2 }
 0xf28   :  { %2207 = vrot.lane.b32.xlu0 %v2000_v30, %s4898_s2 }
 0xf8e   :  { %v4668_v34 = vpop.permute.xlu0 %4667 }
 0xf8f   :  { %v4670_v35 = vunpack.i.h.bf16 %v4668_v34  ;;  %v4669_v13 = vunpack.i.l.bf16 %v4668_v34 }
 0xf91   :  { %v4496_v36 = vpack.c.bf16 %v4670_v35, %v4669_v13 }
 0xf92   :  { %v4678_v63 = vpop.permute.xlu0 %4677 }
 0xf93   :  { %4498 = vmatprep.subr.msk.bf16.mxu1 %vm4999_vm2, %v4496_v36  ;;  %v4680_v5 = vunpack.i.h.bf16 %v4678_v63  ;;  %v4679_v1 = vunpack.i.l.bf16 %v4678_v63 }
 0xf94   :  { %4501 = vmatpush3.bf16.xpose.msk.msra.mxu1 %vm4999_vm2, %v4496_v36 }
 0xf95   :  { %v4506_v6 = vpack.c.bf16 %v4680_v5, %v4679_v1 }
 0xf96   :  { %v2206_v0 = vpop.permute.xlu0 %2205 }
 0xf9a   :  { %v2208_v14 = vpop.permute.xlu0 %2207 }
 0xf9b   :  { %4230 = vmatmul.mubr.msk.f32.vlgmr.msra.gmra.mrb[16].mxu1 %vm263_vm1, %v2000_v30 }
0x106e   :  { %v4231_v38 = vpop.f32.mrb[16].mxu1 }
0x106f   :  { %v2083_v39 = vpop.f32.mrb[17].mxu1  ;;  %v2093_v40 = vmul.f32 0.25, %v4231_v38 }
0x1070   :  { %v2092_v41 = vmul.f32 0.25, %v2083_v39 }
0x1071   :  { %v2095_v45 = vadd.f32 %v2093_v40, %v5014_v46 }
0x1072   :  { %v2094_v42 = vadd.f32 %v2092_v41, %v5016_v49 }
0x1073   :  { %v2099_v47 = vsel %vm263_vm1, %v2095_v45, -inf }
0x1074   :  { %v2096_v44 = vsel %vm263_vm1, %v2094_v42, -inf }
0x1075   :  { %2097 = vmax.xlane.f32.xlu1 %v2096_v44  ;;  %v128_v44 = vld [vmem:[#allocation7 + $0x128] sm:$0xff] }
0x1079   :  { %2100 = vmax.xlane.f32.xlu1 %v2099_v47 }
0x1102   :  { %v2098_v48 = vpop.xlane.xlu1 %2097 }
0x1103   :  { %v2102_v53 = vsub.f32 %v2094_v42, %v2098_v48  ;;  %v127_v42 = vld [vmem:[#allocation7 + $0x120] sm:$0xff] }
0x1105   :  { %v2104_v54 = vmul.f32 1.442695, %v2102_v53 }
0x1106   :  { %v2101_v50 = vpop.xlane.xlu1 %2100 }
0x1107   :  { %v2103_v52 = vsub.f32 %v2095_v45, %v2101_v50  ;;  %v4516_v45 = vpack.c.bf16 %v128_v44, %v127_v42 }
0x1109   :  { %v2106_v55 = vmul.f32 1.442695, %v2103_v52  ;;  %4517 = vmatprep.subr.bf16.mxu1 %v4516_v45 }
0x110a   :  { %4519 = vmatpush3.bf16.msra.mxu1 %v4516_v45 }
0x110b   :  { %4755 = vpow2.f32 %v2106_v55  ;;  %v125_v55 = vld [vmem:[#allocation7 + $0x110] sm:$0xff] }
0x110c   :  { %4757 = vpow2.f32 %v2104_v54 }
0x1115   :  { %v4756_v56 = vpop.eup %4755 }
0x1116   :  { %v2111_v57 = vsel %vm263_vm1, %v4756_v56, 0.0  ;;  %v4758_v58 = vpop.eup %4757 }
0x1117   :  { %2112 = vadd.xlane.f32.xlu1 %v2111_v57  ;;  %v2108_v59 = vsel %vm263_vm1, %v4758_v58, 0.0 }
0x111b   :  { %2109 = vadd.xlane.f32.xlu1 %v2108_v59 }
0x112c   :  { %4672 = vrot.lane.b32.xlu1 %v5175_v33, %s4902_s23 }
0x11a4   :  { %v2113_v60 = vpop.xlane.xlu1 %2112 }
0x11a5   :  { %4759 = vrcp.f32 %v2113_v60  ;;  %v129_v60 = vld [vmem:[#allocation7 + $0x130] sm:$0xff] }
0x11a8   :  { %v2110_v62 = vpop.xlane.xlu1 %2109 }
0x11a9   :  { %4761 = vrcp.f32 %v2110_v62  ;;  %v130_v62 = vld [vmem:[#allocation7 + $0x138] sm:$0xff] }
0x11aa   :  { %v4686_v63 = vpack.i.bf16 %v130_v62, %v129_v60 }
0x11ac   :  { %v4673_v7 = vpop.permute.xlu1 %4672 }
0x11ad   :  { %v4675_v2 = vunpack.i.h.bf16 %v4673_v7  ;;  %v4674_v3 = vunpack.i.l.bf16 %v4673_v7  ;;  %v3832_v7 = vld [vmem:[#allocation7 + $0x1d1] ss:$0 sm:$0xff] }
0x11af   :  { %v4502_v4 = vpack.c.bf16 %v4675_v2, %v4674_v3  ;;  %v4760_v8 = vpop.eup %4759 }
0x11b0   :  { %v2117_v61 = vmul.f32 %v4760_v8, %v4756_v56  ;;  %v126_v56 = vld [vmem:[#allocation7 + $0x118] sm:$0xff] }
0x11b1   :  { %4503 = vmatprep.subr.bf16.mxu0 %v4502_v4  ;;  %v4520_v57 = vpack.c.bf16 %v126_v56, %v125_v55 }
0x11b2   :  { %4505 = vmatpush3.bf16.msra.mxu0 %v4502_v4 }
0x11b3   :  { %v4762_v11 = vpop.eup %4761  ;;  %4508 = vmatprep.subr.msk.bf16.mxu0 %vm4999_vm2, %v4506_v6  ;;  %4521 = vmatprep.subr.bf16.mxu1 %v4520_v57 }
0x11b4   :  { %v2116_v12 = vmul.f32 %v4762_v11, %v4758_v58 }
0x11b6   :  { %4236 = vmatprep.mubr.msk.f32.mxu0 %vm263_vm1, %v2116_v12 }
0x11b7   :  { %4237 = vmatmul.mubr.msk.f32.vlgmr.msra.gmra.mrb[20].mxu0 %vm263_vm1, %v2117_v61 }
0x11b8   :  { %4243 = vmatprep.mubr.msk.f32.mxu0 %vm263_vm1, %v2206_v0 }
0x11bb   :  { %4511 = vmatpush3.bf16.xpose.msk.msra.mxu0 %vm4999_vm2, %v4506_v6 }
0x11c2   :  { %4244 = vmatmul.mubr.msk.f32.vlgmr.msra.gmra.mrb[22].mxu0 %vm263_vm1, %v2208_v14 }
0x128a   :  { %v4238_v15 = vpop.f32.mrb[20].mxu0 }
0x128b   :  { %v2196_v16 = vpop.f32.mrb[21].mxu0 }
0x1295   :  { %v4245_v18 = vpop.f32.mrb[22].mxu0 }
0x1296   :  { %v2297_v19 = vmul.f32 0.25, %v4245_v18  ;;  %v2287_v20 = vpop.f32.mrb[23].mxu0  ;;  %v132_v18 = vld [vmem:[#allocation7 + $0x148] sm:$0xff] }
0x1297   :  { %v2296_v21 = vmul.f32 0.25, %v2287_v20 }
0x1298   :  { %v2299_v22 = vadd.f32 %v2297_v19, %v5014_v46 }
0x1299   :  { %v2298_v23 = vadd.f32 %v2296_v21, %v5016_v49  ;;  %v4524_v21 = vpack.c.bf16 %v130_v62, %v129_v60 }
0x129a   :  { %v2303_v24 = vsel %vm263_vm1, %v2299_v22, -inf }
0x129b   :  { %2304 = vmax.xlane.f32.xlu1 %v2303_v24  ;;  %v2300_v25 = vsel %vm263_vm1, %v2298_v23, -inf }
0x129c   :  { %2301 = vmax.xlane.f32.xlu0 %v2300_v25 }
0x12ac   :  { %4682 = vrot.lane.b32.xlu1 %v5175_v33, %s4903_s26 }
0x12b0   :  { %4687 = vrot.lane.b32.xlu1 %v4686_v63, %s4899_s21 }
0x1328   :  { %v2305_v28 = vpop.xlane.xlu1 %2304 }
0x1329   :  { %v2307_v29 = vsub.f32 %v2299_v22, %v2305_v28  ;;  %v2302_v30 = vpop.xlane.xlu0 %2301 }
0x132a   :  { %v2306_v31 = vsub.f32 %v2298_v23, %v2302_v30  ;;  %v5230_v23 = vld [vmem:[#allocation7 + $0x1d2] ss:$0 sm:$0xff] }
0x132b   :  { %v2310_v32 = vmul.f32 1.442695, %v2307_v29  ;;  %2723 = vrot.lane.b32.xlu1 %v5230_v23, %s4899_s21 }
0x132c   :  { %v2308_v34 = vmul.f32 1.442695, %v2306_v31  ;;  %v4683_v35 = vpop.permute.xlu1 %4682 }
0x132d   :  { %v4685_v13 = vunpack.i.h.bf16 %v4683_v35  ;;  %v4684_v36 = vunpack.i.l.bf16 %v4683_v35 }
0x132e   :  { %4763 = vpow2.f32 %v2308_v34 }
0x132f   :  { %v4512_v38 = vpack.c.bf16 %v4685_v13, %v4684_v36  ;;  %4765 = vpow2.f32 %v2310_v32 }
0x1331   :  { %4513 = vmatprep.subr.bf16.mxu0 %v4512_v38 }
0x1332   :  { %4515 = vmatpush3.bf16.msra.mxu0 %v4512_v38 }
0x1333   :  { %4525 = vmatprep.subr.bf16.mxu0 %v4524_v21 }
0x1338   :  { %v4764_v39 = vpop.eup %4763 }
0x1339   :  { %v2312_v40 = vsel %vm263_vm1, %v4764_v39, 0.0  ;;  %v4766_v41 = vpop.eup %4765 }
0x133a   :  { %2313 = vadd.xlane.f32.xlu0 %v2312_v40  ;;  %v2315_v33 = vsel %vm263_vm1, %v4766_v41, 0.0 }
0x133e   :  { %2316 = vadd.xlane.f32.xlu0 %v2315_v33 }
0x13c7   :  { %v2314_v47 = vpop.xlane.xlu0 %2313 }
0x13c8   :  { %4767 = vrcp.f32 %v2314_v47 }
0x13cb   :  { %v2317_v48 = vpop.xlane.xlu0 %2316 }
0x13cc   :  { %4769 = vrcp.f32 %v2317_v48 }
0x13d2   :  { %v4768_v53 = vpop.eup %4767 }
0x13d3   :  { %v2320_v50 = vmul.f32 %v4768_v53, %v4764_v39  ;;  %v3833_v53 = vld [vmem:[#allocation7 + $0x1d6] ss:$0 sm:$0xff] }
0x13d5   :  { %4250 = vmatprep.mubr.msk.f32.mxu0 %vm263_vm1, %v2320_v50 }
0x13d6   :  { %v4770_v52 = vpop.eup %4769 }
0x13d7   :  { %v2321_v54 = vmul.f32 %v4770_v52, %v4766_v41 }
0x13d9   :  { %4251 = vmatmul.mubr.msk.f32.vlgmr.msra.gmra.mrb[24].mxu0 %vm263_vm1, %v2321_v54 }
0x13da   :  { %4527 = vmatpush3.bf16.msra.mxu0 %v4524_v21 }
0x14ac   :  { %v4252_v58 = vpop.f32.mrb[24].mxu0 }
0x14ad   :  { %v2400_v59 = vpop.f32.mrb[25].mxu0 }
0x14ae   :  { %4257 = vmatprep.mubr.msk.f32.mxu1 %vm263_vm1, %v2400_v59 }
0x14af   :  { %4258 = vmatmul.mubr.msk.f32.vlgmr.msra.gmra.mrb[18].mxu1 %vm263_vm1, %v4252_v58 }
0x14b0   :  { %4264 = vmatprep.mubr.msk.f32.mxu1 %vm263_vm1, %v2196_v16  ;;  %4523 = vmatpush3.bf16.msra.mxu1 %v4520_v57  ;;  %v131_v16 = vld [vmem:[#allocation7 + $0x140] sm:$0xff] }
0x14b1   :  { %4532 = vmatprep.subr.bf16.mxu1 %v4904_v9  ;;  %v4691_v20 = vpack.i.bf16 %v132_v18, %v131_v16  ;;  %v4528_v22 = vpack.c.bf16 %v132_v18, %v131_v16 }
0x14b3   :  { %4529 = vmatprep.subr.bf16.mxu0 %v4528_v22 }
0x14b4   :  { %4531 = vmatpush3.bf16.msra.mxu0 %v4528_v22 }
0x14b7   :  { %4265 = vmatmul.mubr.msk.f32.vlgmr.msra.gmra.mrb[18].mxu1 %vm263_vm1, %v4238_v15  ;;  %v4688_v15 = vpop.permute.xlu1 %4687 }
0x14b8   :  { %4286 = vmatprep.mubr.msk.f32.mxu1 %vm4905_vm5, %v4906_v10  ;;  %v4689_v19 = vunpack.i.l.bf16 %v4688_v15 }
0x158a   :  { %v4266_v5 = vpop.f32.mrb[18].mxu1 }
0x158b   :  { %v2576_v1 = vadd.f32 %v4266_v5, %v3832_v7  ;;  %v2562_v2 = vpop.f32.mrb[19].mxu1 }
0x158c   :  { %v2575_v3 = vadd.f32 %v3832_v7, %v2562_v2 }
0x158d   :  { %v2578_v4 = vadd.f32 %v2576_v1, %v5168_v27  ;;  %v4690_v27 = vunpack.i.h.bf16 %v4688_v15 }
0x158e   :  { %v2577_v6 = vadd.f32 %v2575_v3, %v5166_v26 }
0x158f   :  { %v2582_v8 = vsel %vm175_vm0, %v2578_v4, 0.0  ;;  %v2588_v12 = vmul.f32 %v2578_v4, %v2578_v4  ;;  %v4533_v26 = vpack.c.bf16 %v4690_v27, %v4689_v19 }
0x1590   :  { %2583 = vadd.xlane.f32.xlu0 %v2582_v8  ;;  %v2579_v11 = vsel %vm175_vm0, %v2577_v6, 0.0  ;;  %v2587_v0 = vmul.f32 %v2577_v6, %v2577_v6 }
0x1591   :  { %v2592_v61 = vsel %vm175_vm0, %v2588_v12, 0.0  ;;  %4534 = vmatpush3.bf16.msra.mxu1 %v4533_v26 }
0x1592   :  { %v2589_v14 = vsel %vm175_vm0, %v2587_v0, 0.0  ;;  %4535 = vmatprep.subr.bf16.mxu1 %v4904_v9 }
0x1594   :  { %2580 = vadd.xlane.f32.xlu0 %v2579_v11 }
0x1598   :  { %2593 = vadd.xlane.f32.xlu0 %v2592_v61 }
0x159c   :  { %2590 = vadd.xlane.f32.xlu0 %v2589_v14 }
0x15b2   :  { %4692 = vrot.lane.b32.xlu0 %v4691_v20, %s4899_s21 }
0x161d   :  { %v2584_v24 = vpop.xlane.xlu0 %2583 }
0x161e   :  { %v2586_v28 = vmul.f32 0.03125, %v2584_v24 }
0x1620   :  { %v2598_v30 = vmul.f32 %v2586_v28, %v2586_v28  ;;  %v2602_v45 = vsub.f32 %v2578_v4, %v2586_v28 }
0x1621   :  { %v2581_v25 = vpop.xlane.xlu0 %2580 }
0x1622   :  { %v2585_v31 = vmul.f32 0.03125, %v2581_v25 }
0x1624   :  { %v2597_v35 = vmul.f32 %v2585_v31, %v2585_v31  ;;  %v2601_v48 = vsub.f32 %v2577_v6, %v2585_v31 }
0x1625   :  { %v2594_v29 = vpop.xlane.xlu0 %2593 }
0x1626   :  { %v2596_v9 = vmul.f32 0.03125, %v2594_v29 }
0x1628   :  { %v2600_v32 = vsub.f32 %v2596_v9, %v2598_v30 }
0x1629   :  { %v2591_v34 = vpop.xlane.xlu0 %2590 }
0x162a   :  { %v2604_v13 = vadd.f32 1e-05, %v2600_v32  ;;  %v2595_v36 = vmul.f32 0.03125, %v2591_v34 }
0x162c   :  { %4771 = vrsqrt.f32 %v2604_v13  ;;  %v2599_v38 = vsub.f32 %v2595_v36, %v2597_v35 }
0x162d   :  { %v4693_v39 = vpop.permute.xlu0 %4692 }
0x162e   :  { %v2603_v40 = vadd.f32 1e-05, %v2599_v38  ;;  %v4695_v41 = vunpack.i.h.bf16 %v4693_v39  ;;  %v4694_v33 = vunpack.i.l.bf16 %v4693_v39 }
0x1630   :  { %4773 = vrsqrt.f32 %v2603_v40  ;;  %v4536_v42 = vpack.c.bf16 %v4695_v41, %v4694_v33 }
0x1632   :  { %4537 = vmatpush3.bf16.msra.mxu1 %v4536_v42 }
0x1635   :  { %4287 = vmatmul.mubr.msk.f32.vlgmr.msra.gmra.mrb[20].mxu1 %vm175_vm0, %v5068_v37  ;;  %v3834_v37 = vld [vmem:[#allocation7 + $0x1d7] ss:$0 sm:$0xff] }
0x1636   :  { %v4772_v44 = vpop.eup %4771  ;;  %4289 = vmatprep.mubr.msk.f32.mxu1 %vm4905_vm5, %v4906_v10 }
0x1637   :  { %v2608_v47 = vmul.f32 %v4772_v44, %v2602_v45 }
0x1639   :  { %4290 = vmatmul.mubr.msk.f32.gmra.mrb[22].mxu1 %vm175_vm0, %v5076_v43  ;;  %v2614_v54 = vmul.f32 %v3833_v53, %v2608_v47 }
0x163a   :  { %v4774_v50 = vpop.eup %4773  ;;  %4292 = vmatprep.mubr.msk.f32.mxu1 %vm4905_vm5, %v4906_v10  ;;  %v2724_v10 = vpop.permute.xlu1 %2723 }
0x163b   :  { %v2607_v52 = vmul.f32 %v4774_v50, %v2601_v48  ;;  %v5246_v57 = vadd.f32 %v3834_v37, %v2614_v54 }
0x163d   :  { %4293 = vmatmul.mubr.msk.f32.gmra.mrb[24].mxu1 %vm175_vm0, %v5082_v51  ;;  %v2613_v55 = vmul.f32 %v3833_v53, %v2607_v52 }
0x163f   :  { %v5244_v56 = vadd.f32 %v3834_v37, %v2613_v55 }
0x1641   :  { %4275 = vmatprep.mubr.msk.f32.mxu0 %vm175_vm0, %v5244_v56 }
0x1642   :  { %4276 = vmatmul.mubr.msk.f32.vlgmr.msra.gmra.mrb[26].mxu0 %vm175_vm0, %v5246_v57 }
0x1708   :  { %v2792_v43 = vpop.f32.mrb[20].mxu1 }
0x1709   :  { %v4288_v58 = vpop.f32.mrb[21].mxu1  ;;  %v2793_v60 = vadd.f32 %v2792_v43, %v2724_v10 }
0x170c   :  { %v2797_v59 = vpop.f32.mrb[22].mxu1 }
0x170d   :  { %v2798_v62 = vadd.f32 %v2797_v59, %v2724_v10  ;;  %v4291_v63 = vpop.f32.mrb[23].mxu1 }
0x170f   :  { %v5252_v51 = vpack.i.bf16 %v2798_v62, %v2793_v60  ;;  %v4538_v7 = vpack.c.bf16 %v2798_v62, %v2793_v60 }
0x1710   :  { %v2802_v5 = vpop.f32.mrb[24].mxu1 }
0x1711   :  { %v5254_v1 = vadd.f32 %v2802_v5, %v2724_v10  ;;  %4697 = vrot.lane.b32.xlu1 %v5252_v51, %s4898_s2  ;;  %4540 = vmatprep.subr.msk.bf16.mxu0 %vm4999_vm2, %v4538_v7  ;;  %v4294_v2 = vpop.f32.mrb[25].mxu1 }
0x1712   :  { %4543 = vmatpush3.bf16.xpose.msk.msra.mxu0 %vm4999_vm2, %v4538_v7 }
0x1713   :  { %4299 = vmatprep.subr.msk.mxu0 %vm263_vm1, %v5254_v1 }
0x1715   :  { %v4277_v3 = vpop.f32.mrb[26].mxu0  ;;  %3020 = vrot.lane.b32.xlu1 %v5254_v1, %s4898_s2 }
0x1716   :  { %v2697_v4 = vpop.f32.mrb[27].mxu0  ;;  %v2703_v8 = vadd.f32 %v4277_v3, %v5230_v23 }
0x1717   :  { %v2698_v6 = vadd.f32 %v5230_v23, %v2697_v4 }
0x1719   :  { %4301 = vmatprep.mubr.msk.f32.mxu0 %vm263_vm1, %v2698_v6  ;;  %3012 = vrot.lane.b32.xlu1 %v2698_v6, %s4898_s2 }
0x171a   :  { %4300 = vmatpush3.xpose.msk.msra.mxu0 %vm263_vm1, %v5254_v1 }
0x171d   :  { %3014 = vrot.lane.b32.xlu1 %v2703_v8, %s4898_s2  ;;  %4302 = vmatmul.mubr.msk.f32.vlgmr.msra.gmra.mrb[28].mxu0 %vm263_vm1, %v2703_v8 }
0x1783   :  { %v4698_v11 = vpop.permute.xlu1 %4697 }
0x1784   :  { %v4700_v12 = vunpack.i.h.bf16 %v4698_v11  ;;  %v4699_v61 = vunpack.i.l.bf16 %v4698_v11 }
0x1786   :  { %v4548_v0 = vpack.c.bf16 %v4700_v12, %v4699_v61 }
0x1787   :  { %v3021_v14 = vpop.permute.xlu1 %3020 }
0x1788   :  { %4550 = vmatprep.subr.msk.bf16.mxu0 %vm4999_vm2, %v4548_v0 }
0x1789   :  { %4553 = vmatpush3.bf16.xpose.msk.msra.mxu0 %vm4999_vm2, %v4548_v0  ;;  %v135_v0 = vld [vmem:[#allocation7 + $0x160] sm:$0xff] }
0x178a   :  { %4317 = vmatprep.subr.msk.mxu0 %vm263_vm1, %v3021_v14 }
0x178b   :  { %v3013_v15 = vpop.permute.xlu1 %3012 }
0x178c   :  { %4319 = vmatprep.mubr.msk.f32.mxu0 %vm263_vm1, %v3013_v15 }
0x178f   :  { %v3015_v16 = vpop.permute.xlu1 %3014 }
0x1791   :  { %4318 = vmatpush3.xpose.msk.msra.mxu0 %vm263_vm1, %v3021_v14  ;;  %v136_v14 = vld [vmem:[#allocation7 + $0x168] sm:$0xff] }
0x1792   :  { %v4558_v15 = vpack.c.bf16 %v136_v14, %v135_v0  ;;  %v147_v0 = vld [vmem:[#allocation7 + $0x1c0] sm:$0xff]  ;;  %v148_v14 = vld [vmem:[#allocation7 + $0x1c8] sm:$0xff] }
0x1794   :  { %4320 = vmatmul.mubr.msk.f32.vlgmr.msra.gmra.mrb[30].mxu0 %vm263_vm1, %v3015_v16  ;;  %v133_v16 = vld [vmem:[#allocation7 + $0x150] sm:$0xff] }
0x17f0   :  { %v4303_v18 = vpop.f32.mrb[28].mxu0 }
0x17f1   :  { %v2897_v27 = vmul.f32 0.25, %v4303_v18  ;;  %v2887_v19 = vpop.f32.mrb[29].mxu0  ;;  %v134_v18 = vld [vmem:[#allocation7 + $0x158] sm:$0xff] }
0x17f2   :  { %v2896_v26 = vmul.f32 0.25, %v2887_v19 }
0x17f3   :  { %v2899_v20 = vadd.f32 %v2897_v27, %v5014_v46  ;;  %v4562_v27 = vpack.c.bf16 %v134_v18, %v133_v16  ;;  %v3862_v16 = vld [vmem:[#allocation7 + $0x1d4] ss:$0 sm:$0xff] }
0x17f4   :  { %v2898_v21 = vadd.f32 %v2896_v26, %v5016_v49 }
0x17f5   :  { %v2903_v17 = vsel %vm1165_vm6, %v2899_v20, -inf }
0x17f6   :  { %2904 = vmax.xlane.f32.xlu1 %v2903_v17  ;;  %v2900_v22 = vsel %vm1165_vm6, %v2898_v21, -inf  ;;  %v3859_v17 = vld [vmem:[#allocation7 + $0x1d3] ss:$0 sm:$0xff] }
0x17f7   :  { %2901 = vmax.xlane.f32.xlu0 %v2900_v22 }
0x1807   :  { %4702 = vrot.lane.b32.xlu1 %v5252_v51, %s4899_s21 }
0x1867   :  { %v4321_v23 = vpop.f32.mrb[30].mxu0 }
0x1868   :  { %v3098_v24 = vpop.f32.mrb[31].mxu0  ;;  %v3108_v25 = vmul.f32 0.25, %v4321_v23 }
0x1869   :  { %v3107_v28 = vmul.f32 0.25, %v3098_v24 }
0x186a   :  { %v3110_v31 = vadd.f32 %v3108_v25, %v5014_v46 }
0x186b   :  { %v3109_v29 = vadd.f32 %v3107_v28, %v5016_v49 }
0x186c   :  { %v3114_v9 = vsel %vm1165_vm6, %v3110_v31, -inf }
0x186d   :  { %v3111_v30 = vsel %vm1165_vm6, %v3109_v29, -inf }
0x186e   :  { %3112 = vmax.xlane.f32.xlu0 %v3111_v30 }
0x1872   :  { %3115 = vmax.xlane.f32.xlu0 %v3114_v9 }
0x1883   :  { %v2905_v32 = vpop.xlane.xlu1 %2904 }
0x1884   :  { %v2907_v34 = vsub.f32 %v2899_v20, %v2905_v32  ;;  %v2902_v35 = vpop.xlane.xlu0 %2901 }
0x1885   :  { %v2906_v13 = vsub.f32 %v2898_v21, %v2902_v35 }
0x1886   :  { %v2910_v36 = vmul.f32 1.442695, %v2907_v34 }
0x1887   :  { %v2908_v38 = vmul.f32 1.442695, %v2906_v13  ;;  %v4703_v39 = vpop.permute.xlu1 %4702  ;;  %v137_v13 = vld [vmem:[#allocation7 + $0x170] sm:$0xff] }
0x1888   :  { %4775 = vpow2.f32 %v2910_v36  ;;  %v4705_v40 = vunpack.i.h.bf16 %v4703_v39  ;;  %v4704_v41 = vunpack.i.l.bf16 %v4703_v39  ;;  %v138_v36 = vld [vmem:[#allocation7 + $0x178] sm:$0xff]  ;;  %v140_v39 = vld [vmem:[#allocation7 + $0x188] sm:$0xff] }
0x1889   :  { %4777 = vpow2.f32 %v2908_v38  ;;  %v139_v38 = vld [vmem:[#allocation7 + $0x180] sm:$0xff] }
0x188a   :  { %v4544_v49 = vpack.c.bf16 %v4705_v40, %v4704_v41  ;;  %v141_v40 = vld [vmem:[#allocation7 + $0x190] sm:$0xff]  ;;  %v142_v41 = vld [vmem:[#allocation7 + $0x198] sm:$0xff] }
0x188c   :  { %4545 = vmatprep.subr.bf16.mxu1 %v4544_v49 }
0x188d   :  { %4547 = vmatpush3.bf16.msra.mxu1 %v4544_v49  ;;  %v143_v49 = vld [vmem:[#allocation7 + $0x1a0] sm:$0xff] }
0x1892   :  { %v4776_v33 = vpop.eup %4775 }
0x1893   :  { %v4778_v46 = vpop.eup %4777  ;;  %v2915_v42 = vsel %vm1165_vm6, %v4776_v33, 0.0 }
0x1894   :  { %2916 = vadd.xlane.f32.xlu0 %v2915_v42  ;;  %v2912_v44 = vsel %vm1165_vm6, %v4778_v46, 0.0 }
0x1895   :  { %2913 = vadd.xlane.f32.xlu1 %v2912_v44  ;;  %v145_v44 = vld [vmem:[#allocation7 + $0x1b0] sm:$0xff] }
0x18a6   :  { %4707 = vrot.lane.b32.xlu1 %v5252_v51, %s4900_s22 }
0x18fb   :  { %v3113_v45 = vpop.xlane.xlu0 %3112 }
0x18fc   :  { %v3117_v47 = vsub.f32 %v3109_v29, %v3113_v45  ;;  %v146_v45 = vld [vmem:[#allocation7 + $0x1b8] sm:$0xff] }
0x18fe   :  { %v3119_v48 = vmul.f32 1.442695, %v3117_v47  ;;  %v4582_v47 = vpack.c.bf16 %v146_v45, %v145_v44 }
0x18ff   :  { %v3116_v53 = vpop.xlane.xlu0 %3115 }
0x1900   :  { %4779 = vpow2.f32 %v3119_v48  ;;  %v3118_v50 = vsub.f32 %v3110_v31, %v3116_v53 }
0x1902   :  { %v3121_v52 = vmul.f32 1.442695, %v3118_v50 }
0x1904   :  { %4781 = vpow2.f32 %v3121_v52 }
0x190a   :  { %v4780_v54 = vpop.eup %4779 }
0x190b   :  { %v3123_v37 = vsel %vm1165_vm6, %v4780_v54, 0.0 }
0x190c   :  { %3124 = vadd.xlane.f32.xlu1 %v3123_v37 }
0x190e   :  { %v4782_v55 = vpop.eup %4781 }
0x190f   :  { %v3126_v43 = vsel %vm1165_vm6, %v4782_v55, 0.0 }
0x1910   :  { %3127 = vadd.xlane.f32.xlu0 %v3126_v43 }
0x191d   :  { %3137 = vrot.lane.b32.xlu1 %v5254_v1, %s4900_s22 }
0x1921   :  { %v2917_v60 = vpop.xlane.xlu0 %2916 }
0x1922   :  { %v2914_v58 = vpop.xlane.xlu1 %2913 }
0x1923   :  { %4783 = vrcp.f32 %v2914_v58 }
0x1924   :  { %4785 = vrcp.f32 %v2917_v60 }
0x1926   :  { %2926 = vrot.lane.b32.xlu0 %v5254_v1, %s4899_s21  ;;  %v4708_v62 = vpop.permute.xlu1 %4707 }
0x1927   :  { %v4710_v7 = vunpack.i.h.bf16 %v4708_v62  ;;  %v4709_v5 = vunpack.i.l.bf16 %v4708_v62 }
0x1929   :  { %v4554_v6 = vpack.c.bf16 %v4710_v7, %v4709_v5  ;;  %v3860_v5 = vld [vmem:[#allocation7 + $0x1d8] ss:$0 sm:$0xff] }
0x192d   :  { %v4784_v10 = vpop.eup %4783 }
0x192e   :  { %v2920_v59 = vmul.f32 %v4784_v10, %v4778_v46  ;;  %v4786_v2 = vpop.eup %4785  ;;  %v144_v46 = vld [vmem:[#allocation7 + $0x1a8] sm:$0xff] }
0x192f   :  { %v2921_v4 = vmul.f32 %v4786_v2, %v4776_v33  ;;  %v4574_v33 = vpack.c.bf16 %v142_v41, %v141_v40  ;;  %v4578_v42 = vpack.c.bf16 %v144_v46, %v143_v49 }
0x1930   :  { %4310 = vmatprep.mubr.msk.f32.mxu1 %vm1165_vm6, %v2920_v59 }
0x1999   :  { %v3125_v63 = vpop.xlane.xlu1 %3124 }
0x199a   :  { %4787 = vrcp.f32 %v3125_v63 }
0x199d   :  { %v3128_v51 = vpop.xlane.xlu0 %3127  ;;  %v3138_v8 = vpop.permute.xlu1 %3137 }
0x199e   :  { %4789 = vrcp.f32 %v3128_v51 }
0x19a1   :  { %v2927_v3 = vpop.permute.xlu0 %2926 }
0x19a2   :  { %4308 = vmatprep.subr.mxu1 %v2927_v3 }
0x19a3   :  { %4309 = vmatpush3.msra.mxu1 %v2927_v3  ;;  %v3861_v3 = vld [vmem:[#allocation7 + $0x1d9] ss:$0 sm:$0xff] }
0x19a4   :  { %v4788_v1 = vpop.eup %4787  ;;  %4311 = vmatmul.mubr.msk.f32.vlgmr.msra.gmra.mrb[26].mxu1 %vm1165_vm6, %v2921_v4  ;;  %4555 = vmatprep.subr.bf16.mxu1 %v4554_v6 }
0x19a5   :  { %4557 = vmatpush3.bf16.msra.mxu1 %v4554_v6  ;;  %v3131_v11 = vmul.f32 %v4788_v1, %v4780_v54 }
0x19a6   :  { %4326 = vmatprep.subr.mxu1 %v3138_v8 }
0x19a7   :  { %4328 = vmatprep.mubr.msk.f32.mxu1 %vm1165_vm6, %v3131_v11 }
0x19a8   :  { %v4790_v12 = vpop.eup %4789 }
0x19a9   :  { %v3132_v61 = vmul.f32 %v4790_v12, %v4782_v55  ;;  %4327 = vmatpush3.msra.mxu1 %v3138_v8 }
0x19aa   :  { %4559 = vmatprep.subr.bf16.mxu1 %v4558_v15 }
0x19ab   :  { %4329 = vmatmul.mubr.msk.f32.vlgmr.msra.gmra.mrb[28].mxu1 %vm1165_vm6, %v3132_v61 }
0x19ac   :  { %4561 = vmatpush3.bf16.msra.mxu1 %v4558_v15  ;;  %v4586_v15 = vpack.c.bf16 %v148_v14, %v147_v0 }
0x19ad   :  { %4563 = vmatprep.subr.bf16.mxu1 %v4562_v27 }
0x1a77   :  { %v4312_v19 = vpop.f32.mrb[26].mxu1 }
0x1a78   :  { %v3003_v26 = vpop.f32.mrb[27].mxu1 }
0x1a7e   :  { %v4330_v20 = vpop.f32.mrb[28].mxu1 }
0x1a7f   :  { %v3214_v21 = vpop.f32.mrb[29].mxu1 }
0x1a80   :  { %4335 = vmatprep.mubr.msk.f32.mxu1 %vm263_vm1, %v3214_v21 }
0x1a81   :  { %4336 = vmatmul.mubr.msk.f32.vlgmr.msra.gmra.mrb[30].mxu1 %vm263_vm1, %v4330_v20 }
0x1a82   :  { %4342 = vmatprep.mubr.msk.f32.mxu1 %vm263_vm1, %v3003_v26  ;;  %4565 = vmatpush3.bf16.msra.mxu1 %v4562_v27 }
0x1a83   :  { %4575 = vmatprep.subr.bf16.mxu1 %v4574_v33 }
0x1a89   :  { %4343 = vmatmul.mubr.msk.f32.vlgmr.msra.gmra.mrb[30].mxu1 %vm263_vm1, %v4312_v19 }
0x1a8a   :  { %4577 = vmatpush3.bf16.msra.mxu1 %v4574_v33 }
0x1a8b   :  { %4579 = vmatprep.subr.bf16.mxu1 %v4578_v42 }
0x1a8e   :  { %4581 = vmatpush3.bf16.msra.mxu1 %v4578_v42 }
0x1a8f   :  { %4583 = vmatprep.subr.bf16.mxu1 %v4582_v47 }
0x1a92   :  { %4585 = vmatpush3.bf16.msra.mxu1 %v4582_v47 }
0x1a93   :  { %4587 = vmatprep.subr.bf16.mxu1 %v4586_v15 }
0x1a96   :  { %4589 = vmatpush3.bf16.msra.mxu1 %v4586_v15 }
0x1b5c   :  { %v4344_v22 = vpop.f32.mrb[30].mxu1 }
0x1b5d   :  { %v3390_v23 = vadd.f32 %v4344_v22, %v3859_v17  ;;  %v3376_v24 = vpop.f32.mrb[31].mxu1 }
0x1b5e   :  { %v3389_v25 = vadd.f32 %v3859_v17, %v3376_v24  ;;  %v3865_v17 = vld [vmem:[#allocation7 + $0x1d5] ss:$0 sm:$0xff] }
0x1b5f   :  { %v3392_v28 = vadd.f32 %v3390_v23, %v5246_v57  ;;  %v4566_v57 = vpack.c.bf16 %v138_v36, %v137_v13  ;;  %v161_v13 = vld [vmem:[#allocation7 + $0x1e0] sm:$0xff]  ;;  %v162_v36 = vld [vmem:[#allocation7 + $0x1e8] sm:$0xff] }
0x1b60   :  { %v3391_v29 = vadd.f32 %v3389_v25, %v5244_v56  ;;  %v4570_v56 = vpack.c.bf16 %v140_v39, %v139_v38  ;;  %v163_v38 = vld [vmem:[#allocation7 + $0x1f0] sm:$0xff]  ;;  %v164_v39 = vld [vmem:[#allocation7 + $0x1f8] sm:$0xff] }
0x1b61   :  { %v3396_v30 = vsel %vm175_vm0, %v3392_v28, 0.0  ;;  %v3402_v34 = vmul.f32 %v3392_v28, %v3392_v28  ;;  %4567 = vmatprep.subr.bf16.mxu0 %v4566_v57 }
0x1b62   :  { %3397 = vadd.xlane.f32.xlu1 %v3396_v30  ;;  %v3393_v31 = vsel %vm175_vm0, %v3391_v29, 0.0  ;;  %v3401_v9 = vmul.f32 %v3391_v29, %v3391_v29  ;;  %4569 = vmatpush3.bf16.msra.mxu0 %v4566_v57  ;;  %v4590_v57 = vpack.c.bf16 %v162_v36, %v161_v13 }
0x1b63   :  { %3394 = vadd.xlane.f32.xlu0 %v3393_v31  ;;  %v3406_v35 = vsel %vm175_vm0, %v3402_v34, 0.0  ;;  %4571 = vmatprep.subr.bf16.mxu0 %v4570_v56 }
0x1b64   :  { %v3403_v32 = vsel %vm175_vm0, %v3401_v9, 0.0 }
0x1b66   :  { %4573 = vmatpush3.bf16.msra.mxu0 %v4570_v56  ;;  %v4594_v56 = vpack.c.bf16 %v164_v39, %v163_v38 }
0x1b67   :  { %3404 = vadd.xlane.f32.xlu0 %v3403_v32  ;;  %4591 = vmatprep.subr.bf16.mxu0 %v4590_v57 }
0x1b6b   :  { %3407 = vadd.xlane.f32.xlu0 %v3406_v35 }
0x1bef   :  { %v3398_v50 = vpop.xlane.xlu1 %3397 }
0x1bf0   :  { %v3395_v48 = vpop.xlane.xlu0 %3394  ;;  %v3400_v54 = vmul.f32 0.03125, %v3398_v50 }
0x1bf1   :  { %v3399_v53 = vmul.f32 0.03125, %v3395_v48 }
0x1bf2   :  { %v3412_v10 = vmul.f32 %v3400_v54, %v3400_v54  ;;  %v3416_v4 = vsub.f32 %v3392_v28, %v3400_v54 }
0x1bf3   :  { %v3411_v37 = vmul.f32 %v3399_v53, %v3399_v53  ;;  %v3415_v51 = vsub.f32 %v3391_v29, %v3399_v53 }
0x1bf4   :  { %v3405_v52 = vpop.xlane.xlu0 %3404 }
0x1bf5   :  { %v3409_v55 = vmul.f32 0.03125, %v3405_v52 }
0x1bf7   :  { %v3413_v43 = vsub.f32 %v3409_v55, %v3411_v37 }
0x1bf8   :  { %v3408_v58 = vpop.xlane.xlu0 %3407 }
0x1bf9   :  { %v3417_v59 = vadd.f32 1e-05, %v3413_v43  ;;  %v3410_v60 = vmul.f32 0.03125, %v3408_v58  ;;  %v3868_v58 = vld [vmem:[#allocation7 + $0x1da] ss:$0 sm:$0xff] }
0x1bfb   :  { %4791 = vrsqrt.f32 %v3417_v59  ;;  %v3414_v62 = vsub.f32 %v3410_v60, %v3412_v10 }
0x1bfd   :  { %v3418_v63 = vadd.f32 1e-05, %v3414_v62  ;;  %v3869_v62 = vld [vmem:[#allocation7 + $0x1db] ss:$0 sm:$0xff] }
0x1bff   :  { %4793 = vrsqrt.f32 %v3418_v63 }
0x1c05   :  { %v4792_v7 = vpop.eup %4791 }
0x1c06   :  { %v3421_v2 = vmul.f32 %v4792_v7, %v3415_v51 }
0x1c08   :  { %v3427_v6 = vmul.f32 %v3860_v5, %v3421_v2  ;;  %v3870_v2 = vld [vmem:[#allocation7 + $0x200] ss:$0 sm:$0xff] }
0x1c09   :  { %v4794_v1 = vpop.eup %4793 }
0x1c0a   :  { %v3422_v8 = vmul.f32 %v4794_v1, %v3416_v4  ;;  %v3433_v11 = vadd.f32 %v3861_v3, %v3427_v6 }
0x1c0c   :  { %v3428_v12 = vmul.f32 %v3860_v5, %v3422_v8  ;;  %4353 = vmatprep.mubr.msk.f32.mxu0 %vm175_vm0, %v3433_v11 }
0x1c0e   :  { %v3434_v61 = vadd.f32 %v3861_v3, %v3428_v12 }
0x1c10   :  { %4354 = vmatmul.mubr.msk.f32.vlgmr.msra.gmra.mrb[32].mxu0 %vm175_vm0, %v3434_v61 }
0x1c11   :  { %4593 = vmatpush3.bf16.msra.mxu0 %v4590_v57 }
0x1c12   :  { %4595 = vmatprep.subr.bf16.mxu0 %v4594_v56 }
0x1c15   :  { %4597 = vmatpush3.bf16.msra.mxu0 %v4594_v56 }
0x1ce3   :  { %v4355_v18 = vpop.f32.mrb[32].mxu0 }
0x1ce4   :  { %v3517_v27 = vadd.f32 %v4355_v18, %v3862_v16  ;;  %v3511_v19 = vpop.f32.mrb[33].mxu0 }
0x1ce5   :  { %v3512_v26 = vadd.f32 %v3862_v16, %v3511_v19 }
0x1ce6   :  { %v3521_v21 = vmax.f32 %v3517_v27, 0.0 }
0x1ce7   :  { %v3520_v20 = vmax.f32 %v3512_v26, 0.0 }
0x1ce9   :  { %4372 = vmatprep.mubr.msk.f32.mxu1 %vm1792_vm7, %v3520_v20 }
0x1cea   :  { %4373 = vmatmul.mubr.msk.f32.vlgmr.msra.gmra.mrb[32].mxu1 %vm1792_vm7, %v3521_v21 }
0x1dbd   :  { %v4374_v22 = vpop.f32.mrb[32].mxu1 }
0x1dbe   :  { %v3604_v23 = vadd.f32 %v4374_v22, %v3865_v17  ;;  %v3598_v24 = vpop.f32.mrb[33].mxu1 }
0x1dbf   :  { %v3599_v25 = vadd.f32 %v3865_v17, %v3598_v24 }
0x1dc0   :  { %v3608_v28 = vadd.f32 %v3604_v23, %v3434_v61 }
0x1dc1   :  { %v3607_v29 = vadd.f32 %v3599_v25, %v3433_v11 }
0x1dc2   :  { %v3612_v30 = vsel %vm175_vm0, %v3608_v28, 0.0  ;;  %v3618_v31 = vmul.f32 %v3608_v28, %v3608_v28 }
0x1dc3   :  { %3613 = vadd.xlane.f32.xlu0 %v3612_v30  ;;  %v3609_v9 = vsel %vm175_vm0, %v3607_v29, 0.0  ;;  %v3617_v32 = vmul.f32 %v3607_v29, %v3607_v29 }
0x1dc4   :  { %3610 = vadd.xlane.f32.xlu1 %v3609_v9  ;;  %v3622_v34 = vsel %vm175_vm0, %v3618_v31, 0.0 }
0x1dc5   :  { %v3619_v35 = vsel %vm175_vm0, %v3617_v32, 0.0 }
0x1dc7   :  { %3623 = vadd.xlane.f32.xlu0 %v3622_v34 }
0x1dc8   :  { %3620 = vadd.xlane.f32.xlu1 %v3619_v35 }
0x1e50   :  { %v3614_v40 = vpop.xlane.xlu0 %3613 }
0x1e51   :  { %v3616_v41 = vmul.f32 0.03125, %v3614_v40  ;;  %v3611_v49 = vpop.xlane.xlu1 %3610 }
0x1e52   :  { %v3615_v33 = vmul.f32 0.03125, %v3611_v49 }
0x1e53   :  { %v3628_v42 = vmul.f32 %v3616_v41, %v3616_v41  ;;  %v3632_v37 = vsub.f32 %v3608_v28, %v3616_v41 }
0x1e54   :  { %v3624_v46 = vpop.xlane.xlu0 %3623  ;;  %v3627_v47 = vmul.f32 %v3615_v33, %v3615_v33  ;;  %v3631_v43 = vsub.f32 %v3607_v29, %v3615_v33 }
0x1e55   :  { %v3626_v44 = vmul.f32 0.03125, %v3624_v46  ;;  %v3621_v45 = vpop.xlane.xlu1 %3620 }
0x1e56   :  { %v3625_v48 = vmul.f32 0.03125, %v3621_v45 }
0x1e57   :  { %v3630_v53 = vsub.f32 %v3626_v44, %v3628_v42 }
0x1e58   :  { %v3629_v50 = vsub.f32 %v3625_v48, %v3627_v47 }
0x1e59   :  { %v3634_v52 = vadd.f32 1e-05, %v3630_v53 }
0x1e5a   :  { %v3633_v54 = vadd.f32 1e-05, %v3629_v50 }
0x1e5b   :  { %4795 = vrsqrt.f32 %v3634_v52 }
0x1e5c   :  { %4797 = vrsqrt.f32 %v3633_v54 }
0x1e65   :  { %v4796_v55 = vpop.eup %4795 }
0x1e66   :  { %v4798_v10 = vpop.eup %4797  ;;  %v3638_v59 = vmul.f32 %v4796_v55, %v3632_v37 }
0x1e67   :  { %v3637_v60 = vmul.f32 %v4798_v10, %v3631_v43 }
0x1e68   :  { %v3644_v63 = vmul.f32 %v3868_v58, %v3638_v59 }
0x1e69   :  { %v3643_v51 = vmul.f32 %v3868_v58, %v3637_v60 }
0x1e6a   :  { %v3650_v5 = vadd.f32 %v3869_v62, %v3644_v63 }
0x1e6b   :  { %v3649_v7 = vadd.f32 %v3869_v62, %v3643_v51 }
0x1e6d   :  { %4383 = vmatprep.mubr.msk.f32.mxu0 %vm175_vm0, %v3649_v7 }
0x1e6e   :  { %4384 = vmatmul.mubr.msk.f32.vlgmr.msra.gmra.mrb[34].mxu0 %vm175_vm0, %v3650_v5 }
0x1f41   :  { %v4385_v3 = vpop.f32.mrb[34].mxu0 }
0x1f42   :  { %v3733_v4 = vadd.f32 %v4385_v3, %v3870_v2  ;;  %v3727_v6 = vpop.f32.mrb[35].mxu0 }
0x1f43   :  { %v3728_v1 = vadd.f32 %v3870_v2, %v3727_v6 }
0x1f44   :  { %3737 = vst [vmem:[#allocation8 + $0x8] sm:$0xff] %v3733_v4 }
0x1f45   :  { %3736 = vst [vmem:[#allocation8] sm:$0xff] %v3728_v1 }
0x1f46   :  { %4876 = shalt.err (!%p4873_p0)
}
0x1f47   :  { %s4877_s5 = scalar_lea.hbm %s5344_s3, 256 }
0x1f48   :  { %p4878_p1 = scmp.ne.s32.totalorder %s5344_s3, %s4877_s5  ;;  %p4881_p2 = scmp.lt.u32.totalorder %s4877_s5, %s5344_s3 }
0x1f4a   :  { %p4883_p3 = pnand %p4881_p2, %p4878_p1 }
0x1f4c   :  { %4886 = shalt.err (!%p4883_p3)
}
0x1f4d   :  { %3749 = dma.vmem_to_hbm [thread:$0]  %s3744_s28, 256, %s5344_s3, [#allocation4], %s4895_s24, %s4895_s24, %s4896_s25  }
0x1f4e   :  { %4891 = dma.done.wait [#allocation4], 256  }
0x1f4f   :  { %4892 = vsyncadd [#allocation4], 4294967040 }
0x1f50   :  { %3753 = vsyncpa [#allocation3], 1 }
0x1f51   :  { %3754 = vsyncpa [#allocation6], 1 }
0x1f52   :  { %3755 = vsyncpa [#allocation4], 1 }

</bundles_post_ra>
